<compile_context>
chip_gen: v5e
topology: v5e:2x2
jax: 0.10.0
libtpu: 0.0.40
codegen_flags: <defaults>
</compile_context>

<pallas_src>
import math
import functools

import jax
import jax.numpy as jnp
from jax.experimental import pallas as pl
from jax.experimental.pallas import tpu as pltpu


# ---------------------------------------------------------------------------
# Hardware-aware knobs
# ---------------------------------------------------------------------------
def _vmem_limit_bytes():
    """Generation-specific scoped-VMEM cap (leave headroom for Mosaic scratch)."""
    cap = None
    try:
        cap = int(getattr(pltpu.get_tpu_info(), "vmem_capacity_bytes"))
    except Exception:
        cap = None
    if cap is None:
        try:
            kind = jax.devices()[0].device_kind.lower()
        except Exception:
            kind = ""
        cap = 64 * 1024 * 1024 if "7" in kind else 128 * 1024 * 1024
    if cap <= 64 * 1024 * 1024:                    # v7x: 64 MiB per TensorCore
        return min(cap - 8 * 1024 * 1024, 56 * 1024 * 1024)
    return min(cap - 24 * 1024 * 1024, 104 * 1024 * 1024)   # v5e / v6e


def _bf16_exp_ok():
    """bf16 EUP exp only on v6e / v7x (v2-v5 EUP/VPU have no bf16)."""
    try:
        kind = jax.devices()[0].device_kind.lower()
    except Exception:
        return False
    return not any(v in kind for v in ("v2", "v3", "v4", "v5"))


def _const_spec(shape, single_buffer):
    """BlockSpec for a grid-invariant (weight/bias) block.

    pipeline_mode=pl.Buffered(1) single-buffers it: the block never changes
    across the grid, so the second pipeline buffer is pure VMEM waste (this is
    what matters at large H on v7x's 64 MiB VMEM).
    """
    index_map = lambda *_: (0,) * len(shape)
    if single_buffer:
        try:
            return pl.BlockSpec(shape, index_map, pipeline_mode=pl.Buffered(1))
        except Exception:
            pass
    return pl.BlockSpec(shape, index_map)


def _pad_seq(S):
    """Pad S so all sequence tiles satisfy the (8, 128) block constraints."""
    if S <= 128:
        return max(8, ((S + 7) // 8) * 8)
    return ((S + 127) // 128) * 128


def _pick_tile(S_p, target):
    """Largest tile <= target dividing S_p (multiple of 128 when actually tiled)."""
    if S_p <= target:
        return S_p
    t = (target // 128) * 128
    while t >= 128:
        if S_p % t == 0:
            return t
        t -= 128
    return S_p


# ---------------------------------------------------------------------------
# Kernels
# ---------------------------------------------------------------------------
def _proj_kernel(x_ref, rm_ref, w_ref, b_ref, q_ref, k_ref, v_ref,
                 *, num_heads, head_dim, scale):
    """Fused q/k/v/q_r/k_r projection + reasoning blend + head-major relayout."""
    Ts = x_ref.shape[1]
    H = x_ref.shape[2]

    x = x_ref[0].astype(jnp.bfloat16)                                  # [Ts, H]
    proj = jnp.dot(x, w_ref[...],
                   preferred_element_type=jnp.float32) + b_ref[...]    # [Ts, 5H] f32
    q   = proj[:, 0 * H:1 * H]
    k   = proj[:, 1 * H:2 * H]
    v   = proj[:, 2 * H:3 * H]
    q_r = proj[:, 3 * H:4 * H]
    k_r = proj[:, 4 * H:5 * H]

    rm = rm_ref[0]                                                     # [Ts, 1]
    q = q + rm * (q_r - q)                      # == q*(1-rm) + q_r*rm
    k = k + rm * (k_r - k)
    q = q * jnp.float32(scale)                  # fold 1/sqrt(hd) into q

    def heads(t):                               # [Ts, H] -> [nh, Ts, hd]
        return jnp.transpose(t.reshape(Ts, num_heads, head_dim), (1, 0, 2))

    q_ref[...] = heads(q).astype(q_ref.dtype)
    k_ref[...] = heads(k).astype(k_ref.dtype)
    v_ref[...] = heads(v).astype(v_ref.dtype)


def _flash_kernel(q_ref, k_ref, v_ref, bias_ref, o_ref,
                  m_ref, l_ref, acc_ref, *, exp_dtype):
    """One (batch*head, q-block, k-block) step of online-softmax attention."""
    ki = pl.program_id(2)

    @pl.when(ki == 0)
    def _():
        m_ref[...] = jnp.full(m_ref.shape, -jnp.inf, m_ref.dtype)
        l_ref[...] = jnp.zeros(l_ref.shape, l_ref.dtype)
        acc_ref[...] = jnp.zeros(acc_ref.shape, acc_ref.dtype)

    q = q_ref[0]                                # [Tq, hd] bf16 (already scaled)
    k = k_ref[0]                                # [Tk, hd] bf16
    v = v_ref[0]                                # [Tk, hd] bf16

    # Scores: contract head_dim directly (no transpose of k needed).
    s = jax.lax.dot_general(q, k, (((1,), (1,)), ((), ())),
                            preferred_element_type=jnp.float32)        # [Tq, Tk]
    s = s + bias_ref[0]                         # additive key mask [1, Tk]

    m_prev = m_ref[...]
    m_new = jnp.maximum(m_prev, jnp.max(s, axis=-1, keepdims=True))
    alpha = jnp.exp(m_prev - m_new)                                    # [Tq, 1]
    p = jnp.exp((s - m_new).astype(exp_dtype))   # bf16 exp on v6e/v7x, f32 on v5e
    l_ref[...] = alpha * l_ref[...] + jnp.sum(p, axis=-1, keepdims=True,
                                              dtype=jnp.float32)
    acc_ref[...] = alpha * acc_ref[...] + jnp.dot(
        p.astype(jnp.bfloat16), v, preferred_element_type=jnp.float32)
    m_ref[...] = m_new

    # Deferred normalization: one multiply per [Tq, hd] instead of per score.
    @pl.when(ki == pl.num_programs(2) - 1)
    def _():
        o_ref[0] = (acc_ref[...] *
                    pl.reciprocal(l_ref[...], approx=True)).astype(o_ref.dtype)


def _out_proj_kernel(ctx_ref, w_ref, b_ref, o_ref, *, num_heads, head_dim):
    """Per-tile head-major -> [Ts, H] relayout + output projection."""
    Ts = ctx_ref.shape[1]
    H = num_heads * head_dim
    ctx = jnp.transpose(ctx_ref[...].astype(jnp.float32), (1, 0, 2)).reshape(Ts, H)
    out = jnp.dot(ctx.astype(jnp.bfloat16), w_ref[...],
                  preferred_element_type=jnp.float32) + b_ref[...]
    o_ref[0] = out.astype(o_ref.dtype)


# ---------------------------------------------------------------------------
# Wrapper
# ---------------------------------------------------------------------------
def reasoning_mha_forward(x, params, reasoning_mask=None, attention_mask=None,
                          *, num_heads, single_buffer_weights=True,
                          q_block=256, k_block=256, row_block=256):
    """x: [B, S, H] float32. params: weights [in, out], biases [1, out]."""
    B, S, H = x.shape
    assert H % num_heads == 0
    nh = num_heads
    hd = H // nh
    scale = 1.0 / math.sqrt(hd)

    if reasoning_mask is None:
        reasoning_mask = jnp.zeros((B, S), jnp.float32)
    if attention_mask is None:
        attention_mask = jnp.ones((B, S), jnp.float32)

    # ---- host-side prep (cheap one-off XLA ops) -----------------------------
    S_p = _pad_seq(S)
    pad = S_p - S
    reasoning_mask = reasoning_mask.astype(jnp.float32)
    attention_mask = attention_mask.astype(jnp.float32)
    if pad:
        x = jnp.pad(x, ((0, 0), (0, pad), (0, 0)))
        reasoning_mask = jnp.pad(reasoning_mask, ((0, 0), (0, pad)))
        attention_mask = jnp.pad(attention_mask, ((0, 0), (0, pad)))  # pad = masked
    rmask = reasoning_mask.reshape(B, S_p, 1)
    # Key mask as a finite additive bias (fully-masked rows -> uniform weights
    # instead of the PyTorch reference's NaN).
    bias = jnp.where(attention_mask.reshape(B, 1, S_p) == 0.0,
                     jnp.float32(-1e30), jnp.float32(0.0))

    # Fuse the five projection weights into one [H, 5H] bf16 matrix; biases
    # stay f32 and are added after the f32 MXU accumulation.
    w_fused = jnp.concatenate([params["wq"], params["wk"], params["wv"],
                               params["wqr"], params["wkr"]],
                              axis=1).astype(jnp.bfloat16)
    b_fused = jnp.concatenate([params["bq"], params["bk"], params["bv"],
                               params["bqr"], params["bkr"]],
                              axis=1).astype(jnp.float32)
    wo = params["wo"].astype(jnp.bfloat16)
    bo = params["bo"].astype(jnp.float32)

    vmem_limit = _vmem_limit_bytes()
    exp_dtype = jnp.bfloat16 if _bf16_exp_ok() else jnp.float32

    Ts = _pick_tile(S_p, row_block)     # projection / out-proj row tile
    Tq = _pick_tile(S_p, q_block)       # flash query tile
    Tk = _pick_tile(S_p, k_block)       # flash key tile

    # ---- 1) fused projection + reasoning blend + head-major relayout --------
    qkv_shape = jax.ShapeDtypeStruct((B * nh, S_p, hd), jnp.bfloat16)
    q_hm, k_hm, v_hm = pl.pallas_call(
        functools.partial(_proj_kernel, num_heads=nh, head_dim=hd, scale=scale),
        out_shape=(qkv_shape, qkv_shape, qkv_shape),
        grid_spec=pltpu.PrefetchScalarGridSpec(
            num_scalar_prefetch=0,
            grid=(B, S_p // Ts),
            in_specs=[
                pl.BlockSpec((1, Ts, H), lambda b, s: (b, s, 0)),      # x
                pl.BlockSpec((1, Ts, 1), lambda b, s: (b, s, 0)),      # reasoning mask
                _const_spec((H, 5 * H), single_buffer_weights),        # fused W
                _const_spec((1, 5 * H), single_buffer_weights),        # fused bias
            ],
            out_specs=(
                pl.BlockSpec((nh, Ts, hd), lambda b, s: (b, s, 0)),
                pl.BlockSpec((nh, Ts, hd), lambda b, s: (b, s, 0)),
                pl.BlockSpec((nh, Ts, hd), lambda b, s: (b, s, 0)),
            ),
        ),
        compiler_params=pltpu.CompilerParams(
            dimension_semantics=("parallel", "parallel"),
            vmem_limit_bytes=vmem_limit),
    )(x, rmask, w_fused, b_fused)

    # ---- 2) flash attention: online softmax, deferred normalization ---------
    ctx_hm = pl.pallas_call(
        functools.partial(_flash_kernel, exp_dtype=exp_dtype),
        out_shape=jax.ShapeDtypeStruct((B * nh, S_p, hd), jnp.bfloat16),
        grid_spec=pltpu.PrefetchScalarGridSpec(
            num_scalar_prefetch=0,
            grid=(B * nh, S_p // Tq, S_p // Tk),
            in_specs=[
                pl.BlockSpec((1, Tq, hd), lambda bh, qi, ki: (bh, qi, 0)),   # q
                pl.BlockSpec((1, Tk, hd), lambda bh, qi, ki: (bh, ki, 0)),   # k
                pl.BlockSpec((1, Tk, hd), lambda bh, qi, ki: (bh, ki, 0)),   # v
                pl.BlockSpec((1, 1, Tk), lambda bh, qi, ki: (bh // nh, 0, ki)),  # bias
            ],
            out_specs=pl.BlockSpec((1, Tq, hd), lambda bh, qi, ki: (bh, qi, 0)),
            scratch_shapes=[
                pltpu.VMEM((Tq, 1), jnp.float32),    # running max m
                pltpu.VMEM((Tq, 1), jnp.float32),    # running denominator l
                pltpu.VMEM((Tq, hd), jnp.float32),   # unnormalized ctx accumulator
            ],
        ),
        compiler_params=pltpu.CompilerParams(
            dimension_semantics=("parallel", "parallel", "arbitrary"),
            vmem_limit_bytes=vmem_limit),
    )(q_hm, k_hm, v_hm, bias)

    # ---- 3) output projection ------------------------------------------------
    out = pl.pallas_call(
        functools.partial(_out_proj_kernel, num_heads=nh, head_dim=hd),
        out_shape=jax.ShapeDtypeStruct((B, S_p, H), x.dtype),
        grid_spec=pltpu.PrefetchScalarGridSpec(
            num_scalar_prefetch=0,
            grid=(B, S_p // Ts),
            in_specs=[
                pl.BlockSpec((nh, Ts, hd), lambda b, s: (b, s, 0)),    # ctx (head-major)
                _const_spec((H, H), single_buffer_weights),            # W_out
                _const_spec((1, H), single_buffer_weights),            # b_out
            ],
            out_specs=pl.BlockSpec((1, Ts, H), lambda b, s: (b, s, 0)),
        ),
        compiler_params=pltpu.CompilerParams(
            dimension_semantics=("parallel", "parallel"),
            vmem_limit_bytes=vmem_limit),
    )(ctx_hm, wo, bo)

    return out[:, :S, :] if pad else out


# ---------------------------------------------------------------------------
# Parameters / reference
# ---------------------------------------------------------------------------
def init_params(key, hidden_size):
    """Deterministic init (weights stored as [in, out], biases [1, out])."""
    names = ["q", "k", "v", "qr", "kr", "o"]
    keys = jax.random.split(key, 2 * len(names))
    bound = 1.0 / math.sqrt(hidden_size)
    params = {}
    for i, n in enumerate(names):
        params[f"w{n}"] = jax.random.uniform(keys[2 * i],
                                             (hidden_size, hidden_size),
                                             jnp.float32, -bound, bound)
        params[f"b{n}"] = jax.random.uniform(keys[2 * i + 1], (1, hidden_size),
                                             jnp.float32, -bound, bound)
    return params


def reference_forward(x, params, reasoning_mask, attention_mask, num_heads):
    """Pure-JAX f32 reference mirroring the PyTorch forward (eval mode)."""
    B, S, H = x.shape
    hd = H // num_heads

    def lin(name):
        return x @ params[f"w{name}"] + params[f"b{name}"]

    q, k, v = lin("q"), lin("k"), lin("v")
    rm = reasoning_mask[..., None]
    q = q * (1 - rm) + lin("qr") * rm
    k = k * (1 - rm) + lin("kr") * rm

    def split(t):
        return t.reshape(B, S, num_heads, hd).transpose(0, 2, 1, 3)

    qh, kh, vh = split(q), split(k), split(v)
    scores = (qh @ kh.transpose(0, 1, 3, 2)) / math.sqrt(hd)
    am = attention_mask[:, None, None, :]
    scores = jnp.where(am == 0, -jnp.inf, scores)
    attn = jax.nn.softmax(scores, axis=-1)
    out = (attn @ vh).transpose(0, 2, 1, 3).reshape(B, S, H)
    return out @ params["wo"] + params["bo"]


if __name__ == "__main__":
    B, S, H, NUM_HEADS = 2, 8, 32, 4

    key = jax.random.PRNGKey(0)
    kx, kp, kr = jax.random.split(key, 3)

    x = jax.random.normal(kx, (B, S, H), jnp.float32)
    params = init_params(kp, H)
    reasoning_mask = (jax.random.uniform(kr, (B, S)) > 0.5).astype(jnp.float32)
    attention_mask = jnp.ones((B, S), jnp.float32).at[:, -2:].set(0.0)

    def run(single_buffer):
        o = reasoning_mha_forward(x, params, reasoning_mask, attention_mask,
                                  num_heads=NUM_HEADS,
                                  single_buffer_weights=single_buffer)
        return jax.block_until_ready(o)

    try:
        out = run(True)
    except Exception:
        # pl.Buffered(1) single-buffering unavailable -> plain (double-buffered) specs.
        out = run(False)

    ref = reference_forward(x, params, reasoning_mask, attention_mask, NUM_HEADS)
    assert out.shape == (B, S, H)
    err = float(jnp.max(jnp.abs(out - ref)))
    # bf16 MXU operands / bf16 intermediates with f32 accumulation.
    assert err < 5e-2, f"max abs err = {err}"

    print("KERNEL_OK")
</pallas_src>

<mosaic_0001>
module attributes {stable_mosaic.version = 11 : i64} {
  func.func @_proj_kernel(%arg0: i32, %arg1: i32, %arg2: memref<1x8x32xf32, #tpu.memory_space<vmem>>, %arg3: memref<1x8x1xf32, #tpu.memory_space<vmem>>, %arg4: memref<32x160xbf16, #tpu.memory_space<vmem>>, %arg5: memref<1x160xf32, #tpu.memory_space<vmem>>, %arg6: memref<4x8x8xbf16, #tpu.memory_space<vmem>>, %arg7: memref<4x8x8xbf16, #tpu.memory_space<vmem>>, %arg8: memref<4x8x8xbf16, #tpu.memory_space<vmem>>) attributes {dimension_semantics = [#tpu.dimension_semantics<parallel>, #tpu.dimension_semantics<parallel>], iteration_bounds = array<i64: 2, 1>, scalar_prefetch = 0 : i64, scratch_operands = 0 : i64, tpu.core_type = #tpu.core_type<tc>, window_params = [{transform_indices = @transform_0, window_bounds = array<i64: 1, 8, 32>}, {transform_indices = @transform_1, window_bounds = array<i64: 1, 8, 1>}, {pipeline_mode = #tpu.pipeline_mode<synchronous>, transform_indices = @transform_2, window_bounds = array<i64: 32, 160>}, {pipeline_mode = #tpu.pipeline_mode<synchronous>, transform_indices = @transform_3, window_bounds = array<i64: 1, 160>}, {transform_indices = @transform_4, window_bounds = array<i64: 4, 8, 8>}, {transform_indices = @transform_5, window_bounds = array<i64: 4, 8, 8>}, {transform_indices = @transform_6, window_bounds = array<i64: 4, 8, 8>}]} {
    %c0 = arith.constant 0 : index
    %c0_0 = arith.constant 0 : index
    %c0_1 = arith.constant 0 : index
    %0 = vector.load %arg2[%c0, %c0_0, %c0_1] : memref<1x8x32xf32, #tpu.memory_space<vmem>>, vector<1x8x32xf32>
    %1 = vector.shape_cast %0 : vector<1x8x32xf32> to vector<8x32xf32>
    %2 = arith.truncf %1 : vector<8x32xf32> to vector<8x32xbf16>
    %c0_2 = arith.constant 0 : index
    %c0_3 = arith.constant 0 : index
    %3 = vector.load %arg4[%c0_2, %c0_3] : memref<32x160xbf16, #tpu.memory_space<vmem>>, vector<32x160xbf16>
    %cst = arith.constant dense<0.000000e+00> : vector<8x160xf32>
    %4 = tpu.matmul %2, %3, %cst {dimension_numbers = #tpu.dot_dimension_numbers<[1], [0], [0], [1], [0, 0, 1, 1], [], []>} : vector<8x32xbf16>, vector<32x160xbf16>, vector<8x160xf32> -> vector<8x160xf32>
    %c0_4 = arith.constant 0 : index
    %c0_5 = arith.constant 0 : index
    %5 = vector.load %arg5[%c0_4, %c0_5] : memref<1x160xf32, #tpu.memory_space<vmem>>, vector<1x160xf32>
    %6 = vector.broadcast %5 : vector<1x160xf32> to vector<8x160xf32>
    %7 = arith.addf %4, %6 : vector<8x160xf32>
    %8 = vector.extract_strided_slice %7 {offsets = [0, 0], sizes = [8, 32], strides = [1, 1]} : vector<8x160xf32> to vector<8x32xf32>
    %9 = vector.extract_strided_slice %7 {offsets = [0, 32], sizes = [8, 32], strides = [1, 1]} : vector<8x160xf32> to vector<8x32xf32>
    %10 = vector.extract_strided_slice %7 {offsets = [0, 64], sizes = [8, 32], strides = [1, 1]} : vector<8x160xf32> to vector<8x32xf32>
    %11 = vector.extract_strided_slice %7 {offsets = [0, 96], sizes = [8, 32], strides = [1, 1]} : vector<8x160xf32> to vector<8x32xf32>
    %12 = vector.extract_strided_slice %7 {offsets = [0, 128], sizes = [8, 32], strides = [1, 1]} : vector<8x160xf32> to vector<8x32xf32>
    %c0_6 = arith.constant 0 : index
    %c0_7 = arith.constant 0 : index
    %c0_8 = arith.constant 0 : index
    %13 = vector.load %arg3[%c0_6, %c0_7, %c0_8] : memref<1x8x1xf32, #tpu.memory_space<vmem>>, vector<1x8x1xf32>
    %14 = vector.shape_cast %13 : vector<1x8x1xf32> to vector<8x1xf32>
    %15 = arith.subf %11, %8 : vector<8x32xf32>
    %16 = vector.broadcast %14 : vector<8x1xf32> to vector<8x32xf32>
    %17 = arith.mulf %16, %15 : vector<8x32xf32>
    %18 = arith.addf %8, %17 : vector<8x32xf32>
    %19 = arith.subf %12, %9 : vector<8x32xf32>
    %20 = vector.broadcast %14 : vector<8x1xf32> to vector<8x32xf32>
    %21 = arith.mulf %20, %19 : vector<8x32xf32>
    %22 = arith.addf %9, %21 : vector<8x32xf32>
    %cst_9 = arith.constant 0.353553385 : f32
    %23 = vector.broadcast %cst_9 : f32 to vector<8x32xf32>
    %24 = arith.mulf %18, %23 : vector<8x32xf32>
    %25 = vector.shape_cast %24 : vector<8x32xf32> to vector<8x4x8xf32>
    %26 = tpu.transpose %25, [1, 0, 2] : vector<8x4x8xf32> -> vector<4x8x8xf32>
    %27 = arith.truncf %26 : vector<4x8x8xf32> to vector<4x8x8xbf16>
    %c0_10 = arith.constant 0 : index
    %c0_11 = arith.constant 0 : index
    %c0_12 = arith.constant 0 : index
    %28 = vector.load %arg6[%c0_10, %c0_11, %c0_12] : memref<4x8x8xbf16, #tpu.memory_space<vmem>>, vector<4x8x8xbf16>
    tpu.vector_store %arg6[%c0_10, %c0_11, %c0_12], %27 {strides = array<i32>} : memref<4x8x8xbf16, #tpu.memory_space<vmem>>, vector<4x8x8xbf16>,
    %29 = vector.shape_cast %22 : vector<8x32xf32> to vector<8x4x8xf32>
    %30 = tpu.transpose %29, [1, 0, 2] : vector<8x4x8xf32> -> vector<4x8x8xf32>
    %31 = arith.truncf %30 : vector<4x8x8xf32> to vector<4x8x8xbf16>
    %c0_13 = arith.constant 0 : index
    %c0_14 = arith.constant 0 : index
    %c0_15 = arith.constant 0 : index
    %32 = vector.load %arg7[%c0_13, %c0_14, %c0_15] : memref<4x8x8xbf16, #tpu.memory_space<vmem>>, vector<4x8x8xbf16>
    tpu.vector_store %arg7[%c0_13, %c0_14, %c0_15], %31 {strides = array<i32>} : memref<4x8x8xbf16, #tpu.memory_space<vmem>>, vector<4x8x8xbf16>,
    %33 = vector.shape_cast %10 : vector<8x32xf32> to vector<8x4x8xf32>
    %34 = tpu.transpose %33, [1, 0, 2] : vector<8x4x8xf32> -> vector<4x8x8xf32>
    %35 = arith.truncf %34 : vector<4x8x8xf32> to vector<4x8x8xbf16>
    %c0_16 = arith.constant 0 : index
    %c0_17 = arith.constant 0 : index
    %c0_18 = arith.constant 0 : index
    %36 = vector.load %arg8[%c0_16, %c0_17, %c0_18] : memref<4x8x8xbf16, #tpu.memory_space<vmem>>, vector<4x8x8xbf16>
    tpu.vector_store %arg8[%c0_16, %c0_17, %c0_18], %35 {strides = array<i32>} : memref<4x8x8xbf16, #tpu.memory_space<vmem>>, vector<4x8x8xbf16>,
    return
  }
  func.func @transform_0(%arg0: i32, %arg1: i32) -> (i32, i32, i32) {
    %c0_i32 = arith.constant 0 : i32
    %c0_i32_0 = arith.constant 0 : i32
    return %arg0, %arg1, %c0_i32 : i32, i32, i32
  }
  func.func @transform_1(%arg0: i32, %arg1: i32) -> (i32, i32, i32) {
    %c0_i32 = arith.constant 0 : i32
    %c0_i32_0 = arith.constant 0 : i32
    return %arg0, %arg1, %c0_i32 : i32, i32, i32
  }
  func.func @transform_2(%arg0: i32, %arg1: i32) -> (i32, i32) {
    %c0_i32 = arith.constant 0 : i32
    %c0_i32_0 = arith.constant 0 : i32
    %c0_i32_1 = arith.constant 0 : i32
    return %c0_i32, %c0_i32_0 : i32, i32
  }
  func.func @transform_3(%arg0: i32, %arg1: i32) -> (i32, i32) {
    %c0_i32 = arith.constant 0 : i32
    %c0_i32_0 = arith.constant 0 : i32
    %c0_i32_1 = arith.constant 0 : i32
    return %c0_i32, %c0_i32_0 : i32, i32
  }
  func.func @transform_4(%arg0: i32, %arg1: i32) -> (i32, i32, i32) {
    %c0_i32 = arith.constant 0 : i32
    %c0_i32_0 = arith.constant 0 : i32
    return %arg0, %arg1, %c0_i32 : i32, i32, i32
  }
  func.func @transform_5(%arg0: i32, %arg1: i32) -> (i32, i32, i32) {
    %c0_i32 = arith.constant 0 : i32
    %c0_i32_0 = arith.constant 0 : i32
    return %arg0, %arg1, %c0_i32 : i32, i32, i32
  }
  func.func @transform_6(%arg0: i32, %arg1: i32) -> (i32, i32, i32) {
    %c0_i32 = arith.constant 0 : i32
    %c0_i32_0 = arith.constant 0 : i32
    return %arg0, %arg1, %c0_i32 : i32, i32, i32
  }
}

module attributes {stable_mosaic.version = 11 : i64} {
  func.func @_proj_kernel(%arg0: i32, %arg1: i32, %arg2: memref<1x8x32xf32, #tpu.memory_space<vmem>>, %arg3: memref<1x8x1xf32, #tpu.memory_space<vmem>>, %arg4: memref<32x160xbf16, #tpu.memory_space<vmem>>, %arg5: memref<1x160xf32, #tpu.memory_space<vmem>>, %arg6: memref<4x8x8xbf16, #tpu.memory_space<vmem>>, %arg7: memref<4x8x8xbf16, #tpu.memory_space<vmem>>, %arg8: memref<4x8x8xbf16, #tpu.memory_space<vmem>>) attributes {dimension_semantics = [#tpu.dimension_semantics<parallel>, #tpu.dimension_semantics<parallel>], iteration_bounds = array<i64: 2, 1>, scalar_prefetch = 0 : i64, scratch_operands = 0 : i64, tpu.core_type = #tpu.core_type<tc>, window_params = [{transform_indices = @transform_0, window_bounds = array<i64: 1, 8, 32>}, {transform_indices = @transform_1, window_bounds = array<i64: 1, 8, 1>}, {pipeline_mode = #tpu.pipeline_mode<synchronous>, transform_indices = @transform_2, window_bounds = array<i64: 32, 160>}, {pipeline_mode = #tpu.pipeline_mode<synchronous>, transform_indices = @transform_3, window_bounds = array<i64: 1, 160>}, {transform_indices = @transform_4, window_bounds = array<i64: 4, 8, 8>}, {transform_indices = @transform_5, window_bounds = array<i64: 4, 8, 8>}, {transform_indices = @transform_6, window_bounds = array<i64: 4, 8, 8>}]} {
    %c0 = arith.constant 0 : index
    %c0_0 = arith.constant 0 : index
    %c0_1 = arith.constant 0 : index
    %0 = vector.load %arg2[%c0, %c0_0, %c0_1] : memref<1x8x32xf32, #tpu.memory_space<vmem>>, vector<1x8x32xf32>
    %1 = vector.shape_cast %0 : vector<1x8x32xf32> to vector<8x32xf32>
    %2 = arith.truncf %1 : vector<8x32xf32> to vector<8x32xbf16>
    %c0_2 = arith.constant 0 : index
    %c0_3 = arith.constant 0 : index
    %3 = vector.load %arg4[%c0_2, %c0_3] : memref<32x160xbf16, #tpu.memory_space<vmem>>, vector<32x160xbf16>
    %cst = arith.constant dense<0.000000e+00> : vector<8x160xf32>
    %4 = tpu.matmul %2, %3, %cst {dimension_numbers = #tpu.dot_dimension_numbers<[1], [0], [0], [1], [0, 0, 1, 1], [], []>} : vector<8x32xbf16>, vector<32x160xbf16>, vector<8x160xf32> -> vector<8x160xf32>
    %c0_4 = arith.constant 0 : index
    %c0_5 = arith.constant 0 : index
    %5 = vector.load %arg5[%c0_4, %c0_5] : memref<1x160xf32, #tpu.memory_space<vmem>>, vector<1x160xf32>
    %6 = vector.broadcast %5 : vector<1x160xf32> to vector<8x160xf32>
    %7 = arith.addf %4, %6 : vector<8x160xf32>
    %8 = vector.extract_strided_slice %7 {offsets = [0, 0], sizes = [8, 32], strides = [1, 1]} : vector<8x160xf32> to vector<8x32xf32>
    %9 = vector.extract_strided_slice %7 {offsets = [0, 32], sizes = [8, 32], strides = [1, 1]} : vector<8x160xf32> to vector<8x32xf32>
    %10 = vector.extract_strided_slice %7 {offsets = [0, 64], sizes = [8, 32], strides = [1, 1]} : vector<8x160xf32> to vector<8x32xf32>
    %11 = vector.extract_strided_slice %7 {offsets = [0, 96], sizes = [8, 32], strides = [1, 1]} : vector<8x160xf32> to vector<8x32xf32>
    %12 = vector.extract_strided_slice %7 {offsets = [0, 128], sizes = [8, 32], strides = [1, 1]} : vector<8x160xf32> to vector<8x32xf32>
    %c0_6 = arith.constant 0 : index
    %c0_7 = arith.constant 0 : index
    %c0_8 = arith.constant 0 : index
    %13 = vector.load %arg3[%c0_6, %c0_7, %c0_8] : memref<1x8x1xf32, #tpu.memory_space<vmem>>, vector<1x8x1xf32>
    %14 = vector.shape_cast %13 : vector<1x8x1xf32> to vector<8x1xf32>
    %15 = arith.subf %11, %8 : vector<8x32xf32>
    %16 = vector.broadcast %14 : vector<8x1xf32> to vector<8x32xf32>
    %17 = arith.mulf %16, %15 : vector<8x32xf32>
    %18 = arith.addf %8, %17 : vector<8x32xf32>
    %19 = arith.subf %12, %9 : vector<8x32xf32>
    %20 = vector.broadcast %14 : vector<8x1xf32> to vector<8x32xf32>
    %21 = arith.mulf %20, %19 : vector<8x32xf32>
    %22 = arith.addf %9, %21 : vector<8x32xf32>
    %cst_9 = arith.constant 0.353553385 : f32
    %23 = vector.broadcast %cst_9 : f32 to vector<8x32xf32>
    %24 = arith.mulf %18, %23 : vector<8x32xf32>
    %25 = vector.shape_cast %24 : vector<8x32xf32> to vector<8x4x8xf32>
    %26 = tpu.transpose %25, [1, 0, 2] : vector<8x4x8xf32> -> vector<4x8x8xf32>
    %27 = arith.truncf %26 : vector<4x8x8xf32> to vector<4x8x8xbf16>
    %c0_10 = arith.constant 0 : index
    %c0_11 = arith.constant 0 : index
    %c0_12 = arith.constant 0 : index
    %28 = vector.load %arg6[%c0_10, %c0_11, %c0_12] : memref<4x8x8xbf16, #tpu.memory_space<vmem>>, vector<4x8x8xbf16>
    tpu.vector_store %arg6[%c0_10, %c0_11, %c0_12], %27 {strides = array<i32>} : memref<4x8x8xbf16, #tpu.memory_space<vmem>>, vector<4x8x8xbf16>,
    %29 = vector.shape_cast %22 : vector<8x32xf32> to vector<8x4x8xf32>
    %30 = tpu.transpose %29, [1, 0, 2] : vector<8x4x8xf32> -> vector<4x8x8xf32>
    %31 = arith.truncf %30 : vector<4x8x8xf32> to vector<4x8x8xbf16>
    %c0_13 = arith.constant 0 : index
    %c0_14 = arith.constant 0 : index
    %c0_15 = arith.constant 0 : index
    %32 = vector.load %arg7[%c0_13, %c0_14, %c0_15] : memref<4x8x8xbf16, #tpu.memory_space<vmem>>, vector<4x8x8xbf16>
    tpu.vector_store %arg7[%c0_13, %c0_14, %c0_15], %31 {strides = array<i32>} : memref<4x8x8xbf16, #tpu.memory_space<vmem>>, vector<4x8x8xbf16>,
    %33 = vector.shape_cast %10 : vector<8x32xf32> to vector<8x4x8xf32>
    %34 = tpu.transpose %33, [1, 0, 2] : vector<8x4x8xf32> -> vector<4x8x8xf32>
    %35 = arith.truncf %34 : vector<4x8x8xf32> to vector<4x8x8xbf16>
    %c0_16 = arith.constant 0 : index
    %c0_17 = arith.constant 0 : index
    %c0_18 = arith.constant 0 : index
    %36 = vector.load %arg8[%c0_16, %c0_17, %c0_18] : memref<4x8x8xbf16, #tpu.memory_space<vmem>>, vector<4x8x8xbf16>
    tpu.vector_store %arg8[%c0_16, %c0_17, %c0_18], %35 {strides = array<i32>} : memref<4x8x8xbf16, #tpu.memory_space<vmem>>, vector<4x8x8xbf16>,
    return
  }
  func.func @transform_0(%arg0: i32, %arg1: i32) -> (i32, i32, i32) {
    %c0_i32 = arith.constant 0 : i32
    %c0_i32_0 = arith.constant 0 : i32
    return %arg0, %arg1, %c0_i32 : i32, i32, i32
  }
  func.func @transform_1(%arg0: i32, %arg1: i32) -> (i32, i32, i32) {
    %c0_i32 = arith.constant 0 : i32
    %c0_i32_0 = arith.constant 0 : i32
    return %arg0, %arg1, %c0_i32 : i32, i32, i32
  }
  func.func @transform_2(%arg0: i32, %arg1: i32) -> (i32, i32) {
    %c0_i32 = arith.constant 0 : i32
    %c0_i32_0 = arith.constant 0 : i32
    %c0_i32_1 = arith.constant 0 : i32
    return %c0_i32, %c0_i32_0 : i32, i32
  }
  func.func @transform_3(%arg0: i32, %arg1: i32) -> (i32, i32) {
    %c0_i32 = arith.constant 0 : i32
    %c0_i32_0 = arith.constant 0 : i32
    %c0_i32_1 = arith.constant 0 : i32
    return %c0_i32, %c0_i32_0 : i32, i32
  }
  func.func @transform_4(%arg0: i32, %arg1: i32) -> (i32, i32, i32) {
    %c0_i32 = arith.constant 0 : i32
    %c0_i32_0 = arith.constant 0 : i32
    return %arg0, %arg1, %c0_i32 : i32, i32, i32
  }
  func.func @transform_5(%arg0: i32, %arg1: i32) -> (i32, i32, i32) {
    %c0_i32 = arith.constant 0 : i32
    %c0_i32_0 = arith.constant 0 : i32
    return %arg0, %arg1, %c0_i32 : i32, i32, i32
  }
  func.func @transform_6(%arg0: i32, %arg1: i32) -> (i32, i32, i32) {
    %c0_i32 = arith.constant 0 : i32
    %c0_i32_0 = arith.constant 0 : i32
    return %arg0, %arg1, %c0_i32 : i32, i32, i32
  }
}

</mosaic_0001>

<bundles_post_ra>
// kernel: tpu_custom_call.1
= control target key start
LH: loop header
LB: loop body
LE: loop exit
PB: predicated region body
PF: predicated region fallthrough
CT: control target
= control target key end

     0   :  { %12 = vsyncpa [#allocation3], 0  ;;  %s1827_s0 = inlined_call_operand.vmem [shape: f32[2,8,32], index: 0, kind: input, shape index: {}]   ;;  %s1828_s1 = inlined_call_operand.vmem [shape: f32[2,8,1], index: 1, kind: input, shape index: {}]   ;;  %s1829_s2 = inlined_call_operand.hbm [shape: bf16[32,160], index: 2, kind: input, shape index: {}]   ;;  %s1830_s3 = inlined_call_operand.vmem [shape: f32[1,160], index: 3, kind: input, shape index: {}]   ;;  %s1831_s4 = inlined_call_operand.hbm [shape: bf16[8,8,8], index: 4, kind: output, shape index: {0}]   ;;  %s1832_s5 = inlined_call_operand.hbm [shape: bf16[8,8,8], index: 5, kind: output, shape index: {1}]   ;;  %s1833_s6 = inlined_call_operand.hbm [shape: bf16[8,8,8], index: 6, kind: output, shape index: {2}]  }
   0x1   :  { %13 = vsyncpa [#allocation4], 0 }
   0x2   :  { %15 = vsyncpa [#allocation4 + $0x1], 0 }
   0x3   :  { %16 = vsyncpa [#allocation7], 0 }
   0x4   :  { %18 = vsyncpa [#allocation7 + $0x1], 0  ;;  %s1459_s21 = smov 0   ;;  %s1461_s22 = smov 0  }
   0x5   :  { %s1463_s23 = smov 0   ;;  %s1465_s24 = smov 0  }
   0x6   :  { %s1467_s25 = smov 0   ;;  %s1469_s26 = smov 0  }
   0x7 LB: > { %s1490_s27 = sadd.s32 4294967295, %s1409_s26   ;;  %s1834_s28 = sadd.s32 4294967294, %s1409_s26   ;;  %s1409_s26 = sphi %s1469_s26, %s24_s26   ;;  %s1405_s25 = sphi %s1467_s25, %s1847_s25   ;;  %s1401_s24 = sphi %s1465_s24, %s1846_s24   ;;  %s1397_s23 = sphi %s1463_s23, %s1845_s23   ;;  %s1393_s22 = sphi %s1461_s22, %s1844_s22   ;;  %s1389_s21 = sphi %s1459_s21, %s1843_s21  }
   0x8   : > { %s36_s29 = sadd.s32 1, %s1405_s25  ;;  %s143_s30 = sadd.s32 1, %s1397_s23 }
   0x9   : > { %p38_p0 = scmp.ge.s32.totalorder %s36_s29, 2  ;;  %p153_p1 = scmp.ne.s32.totalorder %s1397_s23, %s1393_s22 }
   0xa   : > { %p154_p2 = scmp.eq.s32.totalorder %s1490_s27, 1  ;;  %p159_p3 = scmp.ne.s32.totalorder %s1393_s22, %s1389_s21 }
   0xb   : > { %s1849_s29 = smov (%p38_p0, %s36_s29), 0  ;;  %p160_p5 = scmp.eq.s32.totalorder %s1834_s28, 1 }
   0xc   : > { %p1502_p4 = por %p154_p2, %p153_p1  ;;  %s138_s8 = ssub.s32 %s1405_s25, %s1849_s29 }
   0xd   : > { %p1067_p6 = scmp.ge.s32.totalorder %s1409_s26, 1  ;;  %p141_p7 = scmp.eq.s32.totalorder %s138_s8, 0 }
   0xe   : > { %p1511_p8 = por %p160_p5, %p159_p3  ;;  %p223_p9 = scmp.lt.s32.totalorder %s1409_s26, 3 }
   0xf   : > { %s1517_s10 = scalar_select %p141_p7, %s1397_s23, %s143_s30  }
  0x10   : > { %p224_p10 = pnand %p1067_p6, %p223_p9  ;;  %p1137_p11 = scmp.eq.s32.totalorder %s1490_s27, 0 }
  0x11   : > { %s234_s13 = sshll.u32 %s1829_s2, 4  ;;  %s1411_s14 = smov [#allocation2]   ;;  %s235_s13 = int_to_ptr.hbm [resolvable:$true] %s234_s13 }
  0x12   : > { %p1123_p12 = pneg %p224_p10  ;;  %s236_s15 = sshll.u32 %s1411_s14, 4  ;;  %s237_s15 = int_to_ptr.vmem [resolvable:$true] %s236_s15 }
  0x13   : > { %s1412_s16 = smov 128   ;;  %s1413_s17 = smov 8  }
  0x14   : > { %p1124_p13 = pnand %p1137_p11, %p1123_p12  ;;  %275 = sbr.rel (%p224_p10) target bundleno = 689 (0x2b1), region = 36 }
  0x16   : > { %1126 = dma.hbm_to_vmem [thread:$0]  (!%p1124_p13), %s235_s13, 512, %s237_s15, [#allocation3], %s1412_s16, %s1412_s16, %s1413_s17  }
  0x19   : > { %1376 = dma.done.wait (%p1137_p11), [#allocation3], 512  }
  0x1a   : > { %1378 = vsyncadd (%p1137_p11), [#allocation3], 4294966784  ;;  %p325_p0 = scmp.lt.s32.totalorder %s1401_s24, 1  ;;  %v1087_v0 = vld [vmem:[#allocation2 + $0x10] sm:$0xf]  ;;  %vm375_vm0 = vcmask 261120  }
  0x1b   : > { %v1109_v1 = vld [vmem:[#allocation2 + $0x14] sm:$0xf0]  ;;  %v1079_v2 = vld [vmem:[#allocation2] sm:$0xf]  ;;  %v1107_v4 = vld [vmem:[#allocation2 + $0x4] sm:$0xf0] }
  0x1c   : > { %s1525_s18 = scalar_select %p325_p0, %s1401_s24, 1  ;;  %v1088_v3 = vor.u32 %v1109_v1, %v1087_v0  ;;  %v1108_v5 = vld [vmem:[#allocation2 + $0x14] sm:$0xf]  ;;  %v1089_v6 = vld [vmem:[#allocation2 + $0x18] sm:$0xf0]  ;;  %v1080_v9 = vor.u32 %v1107_v4, %v1079_v2  ;;  %v1414_v14 = vmov 0  }
  0x1d   : > { %v1106_v7 = vld [vmem:[#allocation2 + $0x4] sm:$0xf]  ;;  %v1081_v8 = vld [vmem:[#allocation2 + $0x8] sm:$0xf0]  ;;  %v1092_v11 = vor.u32 %v1108_v5, %v1089_v6  ;;  %1201 = vset.pattern.permute.xlu0 %v1414_v14  ;;  %v349_v15 = vld [vmem:[%s1830_s3] sm:$0x3] }
  0x1e   : > { %s1075_s19 = sshll.u32 %s1525_s18, 3  ;;  %385 = vmatpush.bf16.msra.mxu0 %v1088_v3  ;;  %v1084_v12 = vor.u32 %v1106_v7, %v1081_v8  ;;  %v351_v16 = vperm.slane %v349_v15, 0  ;;  %s1415_s13 = smov 96   ;;  %v352_v23 = vperm.slane %v349_v15, 1  ;;  %v1421_v54 = vmov 1983009808  }
  0x1f   : > { %s331_s8 = scalar_lea.vmem %s1827_s0, %s1075_s19  ;;  %398 = vmatpush.bf16.msra.mxu1 %v1092_v11  ;;  %s338_s16 = scalar_lea.vmem %s1828_s1, %s1075_s19  ;;  %v446_v55 = vunpack.c.l.s4 %v1421_v54  ;;  %vm441_vm1 = vcmask 1047556   ;;  %v1422_v2 = vmov 1934713408   ;;  %vm555_vm2 = vcmask 60416  }
  0x20   : > { %v343_v10 = vld [vmem:[%s331_s8] sm:$0xff]  ;;  %s1416_s17 = smov 32   ;;  %s1417_s18 = smov 112   ;;  %v470_v3 = vunpack.c.l.s4 %v1422_v2 }
  0x21   : > { %v344_v13 = vpack.c.bf16 %v343_v10, %v343_v10  ;;  %v405_v21 = vld [vmem:[%s338_s16] sm:$0xff]  ;;  %s1418_s19 = smov 104   ;;  %s1419_s20 = smov 120   ;;  %v1546_v60 = vunpack.c.0.s8 %v446_v55 }
  0x22   : > { %386 = vmatpush.bf16.msra.mxu0 %v1080_v9  ;;  %s1836_s30 = smov 64   ;;  %s1835_s8 = sand.u32 1, %s1393_s22  }
  0x23   : > { %399 = vmatpush.bf16.msra.mxu1 %v1084_v12  ;;  %s1626_s11 = sshll.u32 %s1401_s24, 4  ;;  %s1633_s12 = sshll.u32 %s1835_s8, 4 }
  0x24   : > { %s874_s14 = scalar_lea.hbm %s1832_s5, %s1626_s11  ;;  %s838_s15 = sand.u32 1, %s1490_s27  }
  0x25   : > { %1093 = vmatmul.msk.bf16.vlgmr.msra.gmra.mxu0 %vm375_vm0, %v344_v13  ;;  %s317_s16 = scalar_lea.vmem [#allocation6], %s1633_s12 }
  0x26   : > { %1094 = vmatmul.msk.bf16.vlgmr.msra.gmra.mxu1 %vm375_vm0, %v344_v13 }
  0xa2   : > { %v388_v17 = vpop.f32.mrf.mxu0 }
  0xa3   : > { %v389_v18 = vadd.f32 %v388_v17, %v351_v16  ;;  %v401_v19 = vpop.f32.mrf.mxu1 }
  0xa4   : > { %v402_v25 = vadd.f32 %v401_v19, %v352_v23 }
  0xa5   : > { %407 = vrot.lane.b32.xlu0 %v389_v18, %s1415_s13 }
  0xaa   : > { %v390_v20 = vpop.f32.mrf.mxu0 }
  0xab   : > { %v403_v22 = vpop.f32.mrf.mxu1 }
  0xad   : > { %413 = vperm.xlu0 %1201, %v405_v21  }
 0x117   : > { %v408_v24 = vpop.permute.xlu0 %407 }
 0x118   : > { %v422_v26 = vsub.f32 %v402_v25, %v408_v24  ;;  %v410_v29 = vsub.f32 %v389_v18, %v408_v24 }
 0x11f   : > { %v414_v27 = vpop.permute.xlu0 %413 }
 0x120   : > { %v423_v28 = vmul.f32 %v422_v26, %v414_v27  ;;  %v416_v30 = vmul.f32 %v414_v27, %v410_v29 }
 0x122   : > { %425 = vrot.lane.b32.xlu1 %v423_v28, %s1416_s17 }
 0x12a   : > { %418 = vrot.lane.b32.xlu1 %v416_v30, %s1416_s17  ;;  %s875_s17 = sshll.u32 %s317_s16, 4  ;;  %s1663_s17 = int_to_ptr.vmem [resolvable:$true] %s875_s17 }
 0x194   : > { %v426_v31 = vpop.permute.xlu1 %425 }
 0x195   : > { %v428_v32 = vadd.f32 %v426_v31, %v389_v18 }
 0x197   : > { %v1202_v33 = vpack.i.bf16 %v389_v18, %v428_v32 }
 0x199   : > { %1203 = vrot.lane.b32.xlu2 %v1202_v33, %s1417_s18  ;;  %1213 = vrot.lane.b32.xlu1 %v1202_v33, %s1418_s19 }
 0x19c   : > { %v419_v34 = vpop.permute.xlu1 %418 }
 0x19d   : > { %v421_v35 = vadd.f32 %v419_v34, %v389_v18 }
 0x19f   : > { %v429_v36 = vmul.f32 0.35355338, %v421_v35 }
 0x1a1   : > { %1208 = vrot.lane.b32.xlu2 %v1202_v33, %s1419_s20  ;;  %434 = vrot.lane.b32.xlu0 %v429_v36, %s1417_s18  ;;  %v443_v59 = vrot.slane %v429_v36, 4  ;;  %s1650_s18 = sshll.u32 %s874_s14, 4  ;;  %s878_s18 = int_to_ptr.hbm [resolvable:$true] %s1650_s18 }
 0x1a9   : > { %431 = vrot.lane.b32.xlu0 %v429_v36, %s1419_s20  ;;  %s1281_s20 = sshra.s32 %s878_s18, 4  ;;  %s1282_s20 = int_to_ptr.hbm [resolvable:$true] %s1281_s20 }
 0x1aa   : > { %s1283_s24 = scalar_lea.hbm %s1282_s20, 16  ;;  %p1288_p5 = scmp.lt.s32.totalorder %s1282_s20, %s1832_s5 }
 0x1ab   : > { %p1284_p1 = scmp.ne.s32.totalorder %s1282_s20, %s1283_s24 }
 0x1ad   : > { %p1285_p2 = pnand %p1284_p1, %p1502_p4 }
 0x1af   : > { %p1286_p3 = pneg %p1285_p2 }
 0x1f3   : > { %v1204_v37 = vpop.permute.xlu2 %1203 }
 0x1f4   : > { %v1206_v38 = vunpack.i.h.bf16 %v1204_v37  ;;  %v1205_v39 = vunpack.i.l.bf16 %v1204_v37 }
 0x1f6   : > { %v1217_v40 = vpack.i.bf16 %v1206_v38, %v389_v18  ;;  %v1222_v41 = vpack.i.bf16 %v1205_v39, %v428_v32  ;;  %v1560_v18 = vunpack.c.0.s8 %v470_v3 }
 0x1f8   : > { %1223 = vrot.lane.b32.xlu2 %v1222_v41, %s1415_s13  ;;  %1218 = vrot.lane.b32.xlu1 %v1217_v40, %s1836_s30 }
 0x1fb   : > { %v1209_v42 = vpop.permute.xlu2 %1208 }
 0x1fc   : > { %v1210_v44 = vunpack.i.l.bf16 %v1209_v42  ;;  %v1211_v48 = vunpack.i.h.bf16 %v1209_v42 }
 0x200   : > { %437 = vrot.lane.b32.xlu1 %v429_v36, %s1418_s19  ;;  %s1681_s19 = scalar_lea.sflag [#allocation7], %s838_s15 }
 0x20b   : > { %v1214_v43 = vpop.permute.xlu1 %1213 }
 0x20c   : > { %v1215_v45 = vunpack.i.l.bf16 %v1214_v43  ;;  %v1216_v47 = vunpack.i.h.bf16 %v1214_v43 }
 0x20e   : > { %v1227_v46 = vpack.i.bf16 %v1215_v45, %v1210_v44  ;;  %v1232_v49 = vpack.i.bf16 %v1216_v47, %v1211_v48 }
 0x210   : > { %1228 = vrot.lane.b32.xlu2 %v1227_v46, %s1415_s13 }
 0x213   : > { %v435_v53 = vpop.permute.xlu0 %434 }
 0x214   : > { %v440_v56 = vrot.slane %v435_v53, 4  ;;  %v444_v62 = vsel %vm441_vm1, %v435_v53, %v443_v59 }
 0x215   : > { %v1556_v10 = vperm.slane %v444_v62, %v1546_v60 }
 0x216   : > { %v442_v61 = vsel %vm441_vm1, %v440_v56, %v429_v36 }
 0x217   : > { %v1553_v9 = vperm.slane %v442_v61, %v1546_v60  ;;  %v479_v27 = vrot.slane %v1556_v10, 4 }
 0x218   : > { %1233 = vrot.lane.b32.xlu2 %v1232_v49, %s1836_s30 }
 0x219   : > { %v467_v26 = vrot.slane %v1553_v9, 4 }
 0x21b   : > { %v432_v17 = vpop.permute.xlu0 %431 }
 0x21c   : > { %v455_v28 = vrot.slane %v432_v17, 4 }
 0x252   : > { %v1224_v50 = vpop.permute.xlu2 %1223 }
 0x253   : > { %v1226_v51 = vunpack.i.h.bf16 %v1224_v50  ;;  %v1225_v52 = vunpack.i.l.bf16 %v1224_v50 }
 0x255   : > { %v579_v57 = vrot.slane %v1226_v51, 4  ;;  %v581_v58 = vrot.slane %v1225_v52, 4 }
 0x257   : > { %v580_v63 = vsel %vm441_vm1, %v579_v57, %v1225_v52  ;;  %v582_v0 = vsel %vm441_vm1, %v1226_v51, %v581_v58 }
 0x258   : > { %v586_v11 = vperm.slane %v580_v63, %v1546_v60  ;;  %v590_v12 = vperm.slane %v582_v0, %v1546_v60 }
 0x25a   : > { %v605_v23 = vrot.slane %v586_v11, 4  ;;  %v617_v29 = vrot.slane %v590_v12, 4 }
 0x26a   : > { %v1219_v1 = vpop.permute.xlu1 %1218  ;;  %v1229_v4 = vpop.permute.xlu2 %1228 }
 0x26b   : > { %v1221_v5 = vunpack.i.h.bf16 %v1219_v1  ;;  %v1220_v6 = vunpack.i.l.bf16 %v1219_v1  ;;  %v1231_v7 = vunpack.i.h.bf16 %v1229_v4  ;;  %v1230_v8 = vunpack.i.l.bf16 %v1229_v4 }
 0x26d   : > { %v715_v13 = vrot.slane %v1221_v5, 4  ;;  %v717_v14 = vrot.slane %v1220_v6, 4  ;;  %v591_v15 = vrot.slane %v1231_v7, 4  ;;  %v593_v16 = vrot.slane %v1230_v8, 4 }
 0x26f   : > { %v716_v19 = vsel %vm441_vm1, %v715_v13, %v1220_v6  ;;  %v718_v20 = vsel %vm441_vm1, %v1221_v5, %v717_v14  ;;  %v592_v21 = vsel %vm441_vm1, %v591_v15, %v1230_v8  ;;  %v594_v22 = vsel %vm441_vm1, %v1231_v7, %v593_v16 }
 0x270   : > { %v598_v24 = vperm.slane %v592_v21, %v1546_v60  ;;  %v602_v25 = vperm.slane %v594_v22, %v1546_v60  ;;  %v1571_v30 = vperm.slane %v716_v19, %v1546_v60  ;;  %v1574_v31 = vperm.slane %v718_v20, %v1546_v60 }
 0x272   : > { %v603_v32 = vrot.slane %v598_v24, 4  ;;  %v606_v33 = vsel %vm441_vm1, %v598_v24, %v605_v23  ;;  %v438_v34 = vpop.permute.xlu1 %437  ;;  %v1577_v35 = vpop.permute.xlu2 %1233  ;;  %v615_v37 = vrot.slane %v602_v25, 4  ;;  %v618_v38 = vsel %vm441_vm1, %v602_v25, %v617_v29 }
 0x273   : > { %v614_v36 = vperm.slane %v606_v33, %v1560_v18  ;;  %v453_v39 = vrot.slane %v438_v34, 4  ;;  %v626_v41 = vperm.slane %v618_v38, %v1560_v18  ;;  %v456_v42 = vsel %vm441_vm1, %v438_v34, %v455_v28 }
 0x274   : > { %v604_v40 = vsel %vm441_vm1, %v603_v32, %v586_v11  ;;  %v1236_v43 = vunpack.i.h.bf16 %v1577_v35  ;;  %v616_v45 = vsel %vm441_vm1, %v615_v37, %v590_v12  ;;  %v464_v51 = vperm.slane %v456_v42, %v1546_v60 }
 0x275   : > { %v610_v44 = vperm.slane %v604_v40, %v1560_v18  ;;  %v629_v46 = vrot.slane %v614_v36, 4  ;;  %v454_v47 = vsel %vm441_vm1, %v453_v39, %v432_v17  ;;  %v622_v48 = vperm.slane %v616_v45, %v1560_v18 }
 0x276   : > { %v633_v49 = vrot.slane %v626_v41, 4  ;;  %v460_v50 = vperm.slane %v454_v47, %v1546_v60  ;;  %v1595_v55 = vrot.slane %v1236_v43, 4  ;;  %v477_v17 = vrot.slane %v464_v51, 4 }
 0x277   : > { %v627_v52 = vrot.slane %v610_v44, 4  ;;  %v630_v53 = vsel %vm441_vm1, 0.0, %v629_v46  ;;  %v635_v54 = vsel %vm441_vm1, %v629_v46, %v610_v44  ;;  %v631_v56 = vrot.slane %v622_v48, 4 }
 0x278   : > { %v634_v57 = vsel %vm441_vm1, 0.0, %v633_v49  ;;  %v639_v58 = vperm.slane %v635_v54, %v1546_v60  ;;  %v640_v59 = vrot.slane %v630_v53, 4  ;;  %v646_v62 = vsel %vm441_vm1, %v633_v49, %v622_v48 }
 0x279   : > { %v628_v61 = vsel %vm441_vm1, 0.0, %v627_v52  ;;  %v651_v63 = vrot.slane %v634_v57, 4  ;;  %v465_v0 = vrot.slane %v460_v50, 4  ;;  %v632_v1 = vsel %vm441_vm1, 0.0, %v631_v56 }
 0x27a   : > { %v641_v2 = vsel %vm441_vm1, %v640_v59, %v628_v61  ;;  %v650_v3 = vperm.slane %v646_v62, %v1546_v60  ;;  %v659_v4 = vrot.slane %v639_v58, 4  ;;  %v468_v8 = vsel %vm441_vm1, %v460_v50, %v467_v26 }
 0x27b   : > { %v645_v5 = vperm.slane %v641_v2, %v1546_v60  ;;  %v652_v6 = vsel %vm441_vm1, %v651_v63, %v632_v1  ;;  %v466_v7 = vsel %vm441_vm1, %v465_v0, %v1553_v9  ;;  %v476_v14 = vperm.slane %v468_v8, %v1560_v18 }
 0x27c   : > { %v656_v11 = vperm.slane %v652_v6, %v1546_v60  ;;  %v671_v12 = vrot.slane %v650_v3, 4  ;;  %v472_v13 = vperm.slane %v466_v7, %v1560_v18  ;;  %v480_v19 = vsel %vm441_vm1, %v464_v51, %v479_v27 }
 0x27d   : > { %v657_v15 = vrot.slane %v645_v5, 4  ;;  %v660_v16 = vsel %vm441_vm1, %v645_v5, %v659_v4  ;;  %v488_v22 = vperm.slane %v480_v19, %v1560_v18  ;;  %v478_v25 = vsel %vm441_vm1, %v477_v17, %v1556_v10 }
 0x27e   : > { %v668_v20 = vperm.slane %v660_v16, %v1560_v18  ;;  %v669_v9 = vrot.slane %v656_v11, 4  ;;  %v672_v21 = vsel %vm441_vm1, %v656_v11, %v671_v12  ;;  %v489_v26 = vrot.slane %v472_v13, 4 }
 0x27f   : > { %v658_v23 = vsel %vm441_vm1, %v657_v15, %v639_v58  ;;  %v680_v24 = vperm.slane %v672_v21, %v1560_v18  ;;  %v484_v32 = vperm.slane %v478_v25, %v1560_v18  ;;  %v491_v37 = vrot.slane %v476_v14, 4 }
 0x280   : > { %v664_v28 = vperm.slane %v658_v23, %v1560_v18  ;;  %v670_v27 = vsel %vm441_vm1, %v669_v9, %v650_v3  ;;  %v687_v29 = vrot.slane %v668_v20, 4  ;;  %v490_v36 = vsel %vm441_vm1, 0.0, %v489_v26 }
 0x281   : > { %v676_v33 = vperm.slane %v670_v27, %v1560_v18  ;;  %v685_v34 = vrot.slane %v680_v24, 4  ;;  %v493_v39 = vrot.slane %v484_v32, 4  ;;  %v495_v40 = vrot.slane %v488_v22, 4 }
 0x282   : > { %v683_v10 = vrot.slane %v664_v28, 4  ;;  %v688_v38 = vsel %vm441_vm1, %v680_v24, %v687_v29  ;;  %v492_v45 = vsel %vm441_vm1, 0.0, %v491_v37  ;;  %v497_v52 = vsel %vm441_vm1, %v491_v37, %v472_v13 }
 0x283   : > { %v681_v41 = vrot.slane %v676_v33, 4  ;;  %v686_v42 = vsel %vm441_vm1, %v685_v34, %v668_v20  ;;  %v692_v44 = vpack.c.bf16 %v688_v38, %v688_v38  ;;  %v494_v48 = vsel %vm441_vm1, 0.0, %v493_v39 }
 0x284   : > { %v684_v46 = vsel %vm441_vm1, %v676_v33, %v683_v10  ;;  %v691_v47 = vpack.c.bf16 %v686_v42, %v686_v42  ;;  %v496_v49 = vsel %vm441_vm1, 0.0, %v495_v40  ;;  %v502_v53 = vrot.slane %v492_v45, 4 }
 0x285   : > { %v682_v50 = vsel %vm441_vm1, %v681_v41, %v664_v28  ;;  %v690_v51 = vpack.c.bf16 %v684_v46, %v684_v46  ;;  %v501_v56 = vperm.slane %v497_v52, %v1546_v60  ;;  %v508_v57 = vsel %vm441_vm1, %v495_v40, %v484_v32  ;;  %696 = vst.msk [vmem:[%s317_s16 + $0xc] sm:$0xf] %vm555_vm2, %v692_v44 }
 0x286   : > { %v689_v54 = vpack.c.bf16 %v682_v50, %v682_v50  ;;  %v513_v58 = vrot.slane %v496_v49, 4  ;;  %v503_v59 = vsel %vm441_vm1, %v502_v53, %v490_v36  ;;  %v512_v61 = vperm.slane %v508_v57, %v1546_v60  ;;  %695 = vst.msk [vmem:[%s317_s16 + $0x8] sm:$0xf] %vm555_vm2, %v691_v47 }
 0x287   : > { %v1235_v62 = vunpack.i.l.bf16 %v1577_v35  ;;  %v741_v63 = vrot.slane %v1571_v30, 4  ;;  %v507_v0 = vperm.slane %v503_v59, %v1546_v60  ;;  %v521_v2 = vrot.slane %v501_v56, 4  ;;  %694 = vst.msk [vmem:[%s317_s16 + $0x4] sm:$0xf] %vm555_vm2, %v690_v51 }
 0x288   : > { %v514_v1 = vsel %vm441_vm1, %v513_v58, %v494_v48  ;;  %693 = vst.msk [vmem:[%s317_s16] sm:$0xf] %vm555_vm2, %v689_v54  ;;  %v533_v4 = vrot.slane %v512_v61, 4  ;;  %v753_v7 = vrot.slane %v1574_v31, 4  ;;  %s1287_s16 = scalar_lea.hbm %s1832_s5, 32 }
 0x289   : > { %v518_v3 = vperm.slane %v514_v1, %v1546_v60  ;;  %v728_v5 = vsel %vm441_vm1, %v1595_v55, %v1235_v62  ;;  %v729_v6 = vrot.slane %v1235_v62, 4  ;;  %v519_v8 = vrot.slane %v507_v0, 4  ;;  %p1289_p6 = scmp.lt.s32.totalorder %s1287_s16, %s1283_s24 }
 0x28a   : > { %v522_v11 = vsel %vm441_vm1, %v507_v0, %v521_v2  ;;  %v734_v12 = vperm.slane %v728_v5, %v1546_v60 }
 0x28b   : > { %v530_v55 = vperm.slane %v522_v11, %v1560_v18  ;;  %v531_v13 = vrot.slane %v518_v3, 4  ;;  %v534_v14 = vsel %vm441_vm1, %v518_v3, %v533_v4  ;;  %v730_v15 = vsel %vm441_vm1, %v1236_v43, %v729_v6  ;;  %p1290_p7 = por %p1289_p6, %p1288_p5 }
 0x28c   : > { %v520_v16 = vsel %vm441_vm1, %v519_v8, %v501_v56  ;;  %v542_v17 = vperm.slane %v534_v14, %v1560_v18  ;;  %v738_v19 = vperm.slane %v730_v15, %v1546_v60  ;;  %v739_v20 = vrot.slane %v734_v12, 4 }
 0x28d   : > { %p1291_p9 = pnand %p1290_p7, %p1286_p3 }
 0x28f   : > { %1294 = shalt.err (!%p1291_p9)
}
 0x290   : > { %s1423_s27 = smov 4   ;;  %v526_v35 = vperm.slane %v520_v16, %v1560_v18  ;;  %v532_v43 = vsel %vm441_vm1, %v531_v13, %v512_v61  ;;  %v549_v9 = vrot.slane %v530_v55, 4  ;;  %v742_v21 = vsel %vm441_vm1, %v734_v12, %v741_v63  ;;  %s856_s15 = scalar_lea.hbm %s1831_s4, %s1626_s11 }
 0x291   : > { %1118 = dma.vmem_to_hbm [thread:$0]  (%p1502_p4), %s1663_s17, 256, %s878_s18, %s1681_s19, %s1836_s30, %s1836_s30, %s1423_s27   ;;  %v538_v22 = vperm.slane %v532_v43, %v1560_v18  ;;  %v547_v23 = vrot.slane %v542_v17, 4  ;;  %v740_v24 = vsel %vm441_vm1, %v739_v20, %v1571_v30  ;;  %v750_v25 = vperm.slane %v742_v21, %v1560_v18 }
 0x292   : > { %v545_v26 = vrot.slane %v526_v35, 4  ;;  %v550_v28 = vsel %vm441_vm1, %v542_v17, %v549_v9  ;;  %v746_v27 = vperm.slane %v740_v24, %v1560_v18  ;;  %v751_v29 = vrot.slane %v738_v19, 4  ;;  %s310_s17 = scalar_lea.vmem [#allocation5], %s1633_s12  ;;  %s1718_s20 = sshll.u32 %s856_s15, 4  ;;  %s860_s20 = int_to_ptr.hbm [resolvable:$true] %s1718_s20 }
 0x293   : > { %v543_v32 = vrot.slane %v538_v22, 4  ;;  %v548_v33 = vsel %vm441_vm1, %v547_v23, %v530_v55  ;;  %v554_v34 = vpack.c.bf16 %v550_v28, %v550_v28  ;;  %v754_v36 = vsel %vm441_vm1, %v738_v19, %v753_v7  ;;  %s857_s18 = sshll.u32 %s310_s17, 4  ;;  %s1840_s24 = sand.u32 1, %s1393_s22   ;;  %s1728_s18 = int_to_ptr.vmem [resolvable:$true] %s857_s18 }
 0x294   : > { %v546_v30 = vsel %vm441_vm1, %v538_v22, %v545_v26  ;;  %v553_v37 = vpack.c.bf16 %v548_v33, %v548_v33  ;;  %v752_v10 = vsel %vm441_vm1, %v751_v29, %v1574_v31  ;;  %v762_v38 = vperm.slane %v754_v36, %v1560_v18  ;;  %s834_s13 = scalar_lea.sflag [#allocation4], %s1840_s24  ;;  %s1309_s14 = sshra.s32 %s860_s20, 4  ;;  %s1310_s14 = int_to_ptr.hbm [resolvable:$true] %s1309_s14 }
 0x295   : > { %v544_v39 = vsel %vm441_vm1, %v543_v32, %v526_v35  ;;  %v552_v40 = vpack.c.bf16 %v546_v30, %v546_v30  ;;  %v758_v41 = vperm.slane %v752_v10, %v1560_v18  ;;  %v763_v42 = vrot.slane %v746_v27, 4  ;;  %559 = vst.msk [vmem:[%s310_s17 + $0xc] sm:$0xf] %vm555_vm2, %v554_v34  ;;  %s1311_s16 = scalar_lea.hbm %s1310_s14, 16  ;;  %s1315_s15 = scalar_lea.hbm %s1831_s4, 32 }
 0x296   : > { %v551_v44 = vpack.c.bf16 %v544_v39, %v544_v39  ;;  %v765_v45 = vrot.slane %v750_v25, 4  ;;  %v769_v46 = vrot.slane %v762_v38, 4  ;;  %558 = vst.msk [vmem:[%s310_s17 + $0x8] sm:$0xf] %vm555_vm2, %v553_v37  ;;  %p1312_p10 = scmp.ne.s32.totalorder %s1310_s14, %s1311_s16  ;;  %p1316_p13 = scmp.lt.s32.totalorder %s1310_s14, %s1831_s4 }
 0x297   : > { %v764_v31 = vsel %vm441_vm1, 0.0, %v763_v42  ;;  %v767_v47 = vrot.slane %v758_v41, 4  ;;  %557 = vst.msk [vmem:[%s310_s17 + $0x4] sm:$0xf] %vm555_vm2, %v552_v40  ;;  %p1317_p0 = scmp.lt.s32.totalorder %s1315_s15, %s1311_s16 }
 0x298   : > { %v766_v48 = vsel %vm441_vm1, 0.0, %v765_v45  ;;  %v770_v49 = vsel %vm441_vm1, 0.0, %v769_v46  ;;  %v771_v50 = vsel %vm441_vm1, %v765_v45, %v746_v27  ;;  %v782_v51 = vsel %vm441_vm1, %v769_v46, %v758_v41  ;;  %556 = vst.msk [vmem:[%s310_s17] sm:$0xf] %vm555_vm2, %v551_v44  ;;  %p1313_p11 = pnand %p1312_p10, %p1502_p4 }
 0x299   : > { %v768_v52 = vsel %vm441_vm1, 0.0, %v767_v47  ;;  %v775_v53 = vperm.slane %v771_v50, %v1546_v60  ;;  %v776_v54 = vrot.slane %v766_v48, 4  ;;  %v786_v56 = vperm.slane %v782_v51, %v1546_v60  ;;  %p1318_p1 = por %p1317_p0, %p1316_p13 }
 0x29a   : > { %p1314_p12 = pneg %p1313_p11 }
 0x29c   : > { %p1319_p2 = pnand %p1318_p1, %p1314_p12 }
 0x29e   : > { %1322 = shalt.err (!%p1319_p2)
}
 0x29f   : > { %s1841_s24 = smov 64   ;;  %v787_v57 = vrot.slane %v770_v49, 4  ;;  %v777_v58 = vsel %vm441_vm1, %v776_v54, %v764_v31  ;;  %v795_v59 = vrot.slane %v775_v53, 4  ;;  %v807_v61 = vrot.slane %v786_v56, 4  ;;  %s324_s14 = scalar_lea.vmem [#allocation8], %s1633_s12 }
 0x2a0   : > { %1117 = dma.vmem_to_hbm [thread:$0]  (%p1502_p4), %s1728_s18, 256, %s860_s20, %s834_s13, %s1841_s24, %s1841_s24, %s1423_s27   ;;  %v781_v62 = vperm.slane %v777_v58, %v1546_v60 }
 0x2a1   : > { %v788_v63 = vsel %vm441_vm1, %v787_v57, %v768_v52  ;;  %s892_s20 = scalar_lea.hbm %s1833_s6, %s1626_s11  ;;  %s893_s16 = sshll.u32 %s324_s14, 4  ;;  %s894_s16 = int_to_ptr.vmem [resolvable:$true] %s893_s16 }
 0x2a2   : > { %v792_v0 = vperm.slane %v788_v63, %v1546_v60  ;;  %v793_v1 = vrot.slane %v781_v62, 4  ;;  %v796_v2 = vsel %vm441_vm1, %v781_v62, %v795_v59  ;;  %s1779_s13 = sshll.u32 %s892_s20, 4  ;;  %s1343_s15 = scalar_lea.hbm %s1833_s6, 32  ;;  %s896_s13 = int_to_ptr.hbm [resolvable:$true] %s1779_s13 }
 0x2a3   : > { %v804_v3 = vperm.slane %v796_v2, %v1560_v18  ;;  %s1337_s11 = sshra.s32 %s896_s13, 4  ;;  %s1338_s11 = int_to_ptr.hbm [resolvable:$true] %s1337_s11 }
 0x2a4   : > { %v805_v4 = vrot.slane %v792_v0, 4  ;;  %v808_v5 = vsel %vm441_vm1, %v792_v0, %v807_v61  ;;  %v794_v6 = vsel %vm441_vm1, %v793_v1, %v775_v53  ;;  %s1339_s12 = scalar_lea.hbm %s1338_s11, 16  ;;  %p1344_p7 = scmp.lt.s32.totalorder %s1338_s11, %s1833_s6 }
 0x2a5   : > { %v816_v7 = vperm.slane %v808_v5, %v1560_v18  ;;  %v800_v8 = vperm.slane %v794_v6, %v1560_v18  ;;  %v823_v12 = vrot.slane %v804_v3, 4  ;;  %p1340_p3 = scmp.ne.s32.totalorder %s1338_s11, %s1339_s12  ;;  %p1345_p9 = scmp.lt.s32.totalorder %s1343_s15, %s1339_s12 }
 0x2a6   : > { %v806_v11 = vsel %vm441_vm1, %v805_v4, %v786_v56 }
 0x2a7   : > { %v812_v60 = vperm.slane %v806_v11, %v1560_v18  ;;  %v821_v55 = vrot.slane %v816_v7, 4  ;;  %v819_v13 = vrot.slane %v800_v8, 4  ;;  %v824_v14 = vsel %vm441_vm1, %v816_v7, %v823_v12  ;;  %p1341_p5 = pnand %p1340_p3, %p1502_p4  ;;  %p1346_p10 = por %p1345_p9, %p1344_p7 }
 0x2a8   : > { %v828_v17 = vpack.c.bf16 %v824_v14, %v824_v14 }
 0x2a9   : > { %v817_v15 = vrot.slane %v812_v60, 4  ;;  %v822_v16 = vsel %vm441_vm1, %v821_v55, %v804_v3  ;;  %v820_v19 = vsel %vm441_vm1, %v812_v60, %v819_v13  ;;  %p1342_p6 = pneg %p1341_p5 }
 0x2aa   : > { %v827_v20 = vpack.c.bf16 %v822_v16, %v822_v16  ;;  %v826_v18 = vpack.c.bf16 %v820_v19, %v820_v19  ;;  %832 = vst.msk [vmem:[%s324_s14 + $0xc] sm:$0xf] %vm555_vm2, %v828_v17 }
 0x2ab   : > { %v818_v35 = vsel %vm441_vm1, %v817_v15, %v800_v8  ;;  %p1347_p11 = pnand %p1346_p10, %p1342_p6 }
 0x2ac   : > { %v825_v43 = vpack.c.bf16 %v818_v35, %v818_v35  ;;  %831 = vst.msk [vmem:[%s324_s14 + $0x8] sm:$0xf] %vm555_vm2, %v827_v20 }
 0x2ad   : > { %830 = vst.msk [vmem:[%s324_s14 + $0x4] sm:$0xf] %vm555_vm2, %v826_v18 }
 0x2ae   : > { %829 = vst.msk [vmem:[%s324_s14] sm:$0xf] %vm555_vm2, %v825_v43 }
 0x2af   : > { %1350 = shalt.err (!%p1347_p11)
}
 0x2b0   : > { %1119 = dma.vmem_to_hbm [thread:$0]  (%p1502_p4), %s894_s16, 256, %s896_s13, %s1681_s19, %s1841_s24, %s1841_s24, %s1423_s27  }
 0x2b1 PF: > { %p1139_p12 = scmp.ge.s32.totalorder %s1409_s26, 2  ;;  %s910_s18 = sand.u32 1, %s1389_s21  }
 0x2b2   : > { %s911_s20 = scalar_lea.sflag [#allocation4], %s910_s18 }
 0x2b3   : > { %p1128_p13 = pnand %p1139_p12, %p1511_p8 }
 0x2b5   : > { %p1129_p0 = pneg %p1128_p13 }
 0x2b7   : > { %1380 = dma.done.wait (%p1129_p0), %s911_s20, 256  }
 0x2b8   : > { %1382 = vsyncadd (%p1129_p0), %s911_s20, 4294967040  ;;  %s1842_s14 = sadd.s32 4294967294, %s1409_s26  }
 0x2b9   : > { %s920_s7 = sand.u32 1, %s1842_s14  }
 0x2ba   : > { %s921_s11 = scalar_lea.sflag [#allocation7], %s920_s7 }
 0x2bb   : > { %1384 = dma.done.wait (%p1129_p0), %s921_s11, 512  }
 0x2bc   : > { %1386 = vsyncadd (%p1129_p0), %s921_s11, 4294966784  ;;  %s24_s26 = sadd.s32 1, %s1409_s26   ;;  %s1843_s21 = smov %s1393_s22 }
 0x2bd   : > { %p21_p4 = scmp.ge.s32.totalorder %s24_s26, 4   ;;  %s1844_s22 = smov %s1397_s23 }
 0x2be   : > { %s1845_s23 = smov %s1517_s10  ;;  %s1846_s24 = smov %s1405_s25 }
 0x2bf   : > { %s1847_s25 = smov %s1849_s29  ;;  %23 = sbr.rel (!%p21_p4) target bundleno = 7 (0x7), region = 111 }
 0x2c4   :  { %937 = vsyncpa [#allocation3], 1 }
 0x2c5   :  { %939 = vsyncpa [#allocation3 + $0x1], 1 }
 0x2c6   :  { %940 = vsyncpa [#allocation4], 1 }
 0x2c7   :  { %942 = vsyncpa [#allocation4 + $0x1], 1 }
 0x2c8   :  { %943 = vsyncpa [#allocation7], 1 }
 0x2c9   :  { %945 = vsyncpa [#allocation7 + $0x1], 1 }

// kernel: tpu_custom_call.1
= control target key start
LH: loop header
LB: loop body
LE: loop exit
PB: predicated region body
PF: predicated region fallthrough
CT: control target
= control target key end

     0   :  { %12 = vsyncpa [#allocation3], 0  ;;  %s1827_s0 = inlined_call_operand.vmem [shape: f32[2,8,32], index: 0, kind: input, shape index: {}]   ;;  %s1828_s1 = inlined_call_operand.vmem [shape: f32[2,8,1], index: 1, kind: input, shape index: {}]   ;;  %s1829_s2 = inlined_call_operand.hbm [shape: bf16[32,160], index: 2, kind: input, shape index: {}]   ;;  %s1830_s3 = inlined_call_operand.vmem [shape: f32[1,160], index: 3, kind: input, shape index: {}]   ;;  %s1831_s4 = inlined_call_operand.hbm [shape: bf16[8,8,8], index: 4, kind: output, shape index: {0}]   ;;  %s1832_s5 = inlined_call_operand.hbm [shape: bf16[8,8,8], index: 5, kind: output, shape index: {1}]   ;;  %s1833_s6 = inlined_call_operand.hbm [shape: bf16[8,8,8], index: 6, kind: output, shape index: {2}]  }
   0x1   :  { %13 = vsyncpa [#allocation4], 0 }
   0x2   :  { %15 = vsyncpa [#allocation4 + $0x1], 0 }
   0x3   :  { %16 = vsyncpa [#allocation7], 0 }
   0x4   :  { %18 = vsyncpa [#allocation7 + $0x1], 0  ;;  %s1459_s21 = smov 0   ;;  %s1461_s22 = smov 0  }
   0x5   :  { %s1463_s23 = smov 0   ;;  %s1465_s24 = smov 0  }
   0x6   :  { %s1467_s25 = smov 0   ;;  %s1469_s26 = smov 0  }
   0x7 LB: > { %s1490_s27 = sadd.s32 4294967295, %s1409_s26   ;;  %s1834_s28 = sadd.s32 4294967294, %s1409_s26   ;;  %s1409_s26 = sphi %s1469_s26, %s24_s26   ;;  %s1405_s25 = sphi %s1467_s25, %s1847_s25   ;;  %s1401_s24 = sphi %s1465_s24, %s1846_s24   ;;  %s1397_s23 = sphi %s1463_s23, %s1845_s23   ;;  %s1393_s22 = sphi %s1461_s22, %s1844_s22   ;;  %s1389_s21 = sphi %s1459_s21, %s1843_s21  }
   0x8   : > { %s36_s29 = sadd.s32 1, %s1405_s25  ;;  %s143_s30 = sadd.s32 1, %s1397_s23 }
   0x9   : > { %p38_p0 = scmp.ge.s32.totalorder %s36_s29, 2  ;;  %p153_p1 = scmp.ne.s32.totalorder %s1397_s23, %s1393_s22 }
   0xa   : > { %p154_p2 = scmp.eq.s32.totalorder %s1490_s27, 1  ;;  %p159_p3 = scmp.ne.s32.totalorder %s1393_s22, %s1389_s21 }
   0xb   : > { %s1849_s29 = smov (%p38_p0, %s36_s29), 0  ;;  %p160_p5 = scmp.eq.s32.totalorder %s1834_s28, 1 }
   0xc   : > { %p1502_p4 = por %p154_p2, %p153_p1  ;;  %s138_s8 = ssub.s32 %s1405_s25, %s1849_s29 }
   0xd   : > { %p1067_p6 = scmp.ge.s32.totalorder %s1409_s26, 1  ;;  %p141_p7 = scmp.eq.s32.totalorder %s138_s8, 0 }
   0xe   : > { %p1511_p8 = por %p160_p5, %p159_p3  ;;  %p223_p9 = scmp.lt.s32.totalorder %s1409_s26, 3 }
   0xf   : > { %s1517_s10 = scalar_select %p141_p7, %s1397_s23, %s143_s30  }
  0x10   : > { %p224_p10 = pnand %p1067_p6, %p223_p9  ;;  %p1137_p11 = scmp.eq.s32.totalorder %s1490_s27, 0 }
  0x11   : > { %s234_s13 = sshll.u32 %s1829_s2, 4  ;;  %s1411_s14 = smov [#allocation2]   ;;  %s235_s13 = int_to_ptr.hbm [resolvable:$true] %s234_s13 }
  0x12   : > { %p1123_p12 = pneg %p224_p10  ;;  %s236_s15 = sshll.u32 %s1411_s14, 4  ;;  %s237_s15 = int_to_ptr.vmem [resolvable:$true] %s236_s15 }
  0x13   : > { %s1412_s16 = smov 128   ;;  %s1413_s17 = smov 8  }
  0x14   : > { %p1124_p13 = pnand %p1137_p11, %p1123_p12  ;;  %275 = sbr.rel (%p224_p10) target bundleno = 689 (0x2b1), region = 36 }
  0x16   : > { %1126 = dma.hbm_to_vmem [thread:$0]  (!%p1124_p13), %s235_s13, 512, %s237_s15, [#allocation3], %s1412_s16, %s1412_s16, %s1413_s17  }
  0x19   : > { %1376 = dma.done.wait (%p1137_p11), [#allocation3], 512  }
  0x1a   : > { %1378 = vsyncadd (%p1137_p11), [#allocation3], 4294966784  ;;  %p325_p0 = scmp.lt.s32.totalorder %s1401_s24, 1  ;;  %v1087_v0 = vld [vmem:[#allocation2 + $0x10] sm:$0xf]  ;;  %vm375_vm0 = vcmask 261120  }
  0x1b   : > { %v1109_v1 = vld [vmem:[#allocation2 + $0x14] sm:$0xf0]  ;;  %v1079_v2 = vld [vmem:[#allocation2] sm:$0xf]  ;;  %v1107_v4 = vld [vmem:[#allocation2 + $0x4] sm:$0xf0] }
  0x1c   : > { %s1525_s18 = scalar_select %p325_p0, %s1401_s24, 1  ;;  %v1088_v3 = vor.u32 %v1109_v1, %v1087_v0  ;;  %v1108_v5 = vld [vmem:[#allocation2 + $0x14] sm:$0xf]  ;;  %v1089_v6 = vld [vmem:[#allocation2 + $0x18] sm:$0xf0]  ;;  %v1080_v9 = vor.u32 %v1107_v4, %v1079_v2  ;;  %v1414_v14 = vmov 0  }
  0x1d   : > { %v1106_v7 = vld [vmem:[#allocation2 + $0x4] sm:$0xf]  ;;  %v1081_v8 = vld [vmem:[#allocation2 + $0x8] sm:$0xf0]  ;;  %v1092_v11 = vor.u32 %v1108_v5, %v1089_v6  ;;  %1201 = vset.pattern.permute.xlu0 %v1414_v14  ;;  %v349_v15 = vld [vmem:[%s1830_s3] sm:$0x3] }
  0x1e   : > { %s1075_s19 = sshll.u32 %s1525_s18, 3  ;;  %385 = vmatpush.bf16.msra.mxu0 %v1088_v3  ;;  %v1084_v12 = vor.u32 %v1106_v7, %v1081_v8  ;;  %v351_v16 = vperm.slane %v349_v15, 0  ;;  %s1415_s13 = smov 96   ;;  %v352_v23 = vperm.slane %v349_v15, 1  ;;  %v1421_v54 = vmov 1983009808  }
  0x1f   : > { %s331_s8 = scalar_lea.vmem %s1827_s0, %s1075_s19  ;;  %398 = vmatpush.bf16.msra.mxu1 %v1092_v11  ;;  %s338_s16 = scalar_lea.vmem %s1828_s1, %s1075_s19  ;;  %v446_v55 = vunpack.c.l.s4 %v1421_v54  ;;  %vm441_vm1 = vcmask 1047556   ;;  %v1422_v2 = vmov 1934713408   ;;  %vm555_vm2 = vcmask 60416  }
  0x20   : > { %v343_v10 = vld [vmem:[%s331_s8] sm:$0xff]  ;;  %s1416_s17 = smov 32   ;;  %s1417_s18 = smov 112   ;;  %v470_v3 = vunpack.c.l.s4 %v1422_v2 }
  0x21   : > { %v344_v13 = vpack.c.bf16 %v343_v10, %v343_v10  ;;  %v405_v21 = vld [vmem:[%s338_s16] sm:$0xff]  ;;  %s1418_s19 = smov 104   ;;  %s1419_s20 = smov 120   ;;  %v1546_v60 = vunpack.c.0.s8 %v446_v55 }
  0x22   : > { %386 = vmatpush.bf16.msra.mxu0 %v1080_v9  ;;  %s1836_s30 = smov 64   ;;  %s1835_s8 = sand.u32 1, %s1393_s22  }
  0x23   : > { %399 = vmatpush.bf16.msra.mxu1 %v1084_v12  ;;  %s1626_s11 = sshll.u32 %s1401_s24, 4  ;;  %s1633_s12 = sshll.u32 %s1835_s8, 4 }
  0x24   : > { %s874_s14 = scalar_lea.hbm %s1832_s5, %s1626_s11  ;;  %s838_s15 = sand.u32 1, %s1490_s27  }
  0x25   : > { %1093 = vmatmul.msk.bf16.vlgmr.msra.gmra.mxu0 %vm375_vm0, %v344_v13  ;;  %s317_s16 = scalar_lea.vmem [#allocation6], %s1633_s12 }
  0x26   : > { %1094 = vmatmul.msk.bf16.vlgmr.msra.gmra.mxu1 %vm375_vm0, %v344_v13 }
  0xa2   : > { %v388_v17 = vpop.f32.mrf.mxu0 }
  0xa3   : > { %v389_v18 = vadd.f32 %v388_v17, %v351_v16  ;;  %v401_v19 = vpop.f32.mrf.mxu1 }
  0xa4   : > { %v402_v25 = vadd.f32 %v401_v19, %v352_v23 }
  0xa5   : > { %407 = vrot.lane.b32.xlu0 %v389_v18, %s1415_s13 }
  0xaa   : > { %v390_v20 = vpop.f32.mrf.mxu0 }
  0xab   : > { %v403_v22 = vpop.f32.mrf.mxu1 }
  0xad   : > { %413 = vperm.xlu0 %1201, %v405_v21  }
 0x117   : > { %v408_v24 = vpop.permute.xlu0 %407 }
 0x118   : > { %v422_v26 = vsub.f32 %v402_v25, %v408_v24  ;;  %v410_v29 = vsub.f32 %v389_v18, %v408_v24 }
 0x11f   : > { %v414_v27 = vpop.permute.xlu0 %413 }
 0x120   : > { %v423_v28 = vmul.f32 %v422_v26, %v414_v27  ;;  %v416_v30 = vmul.f32 %v414_v27, %v410_v29 }
 0x122   : > { %425 = vrot.lane.b32.xlu1 %v423_v28, %s1416_s17 }
 0x12a   : > { %418 = vrot.lane.b32.xlu1 %v416_v30, %s1416_s17  ;;  %s875_s17 = sshll.u32 %s317_s16, 4  ;;  %s1663_s17 = int_to_ptr.vmem [resolvable:$true] %s875_s17 }
 0x194   : > { %v426_v31 = vpop.permute.xlu1 %425 }
 0x195   : > { %v428_v32 = vadd.f32 %v426_v31, %v389_v18 }
 0x197   : > { %v1202_v33 = vpack.i.bf16 %v389_v18, %v428_v32 }
 0x199   : > { %1203 = vrot.lane.b32.xlu2 %v1202_v33, %s1417_s18  ;;  %1213 = vrot.lane.b32.xlu1 %v1202_v33, %s1418_s19 }
 0x19c   : > { %v419_v34 = vpop.permute.xlu1 %418 }
 0x19d   : > { %v421_v35 = vadd.f32 %v419_v34, %v389_v18 }
 0x19f   : > { %v429_v36 = vmul.f32 0.35355338, %v421_v35 }
 0x1a1   : > { %1208 = vrot.lane.b32.xlu2 %v1202_v33, %s1419_s20  ;;  %434 = vrot.lane.b32.xlu0 %v429_v36, %s1417_s18  ;;  %v443_v59 = vrot.slane %v429_v36, 4  ;;  %s1650_s18 = sshll.u32 %s874_s14, 4  ;;  %s878_s18 = int_to_ptr.hbm [resolvable:$true] %s1650_s18 }
 0x1a9   : > { %431 = vrot.lane.b32.xlu0 %v429_v36, %s1419_s20  ;;  %s1281_s20 = sshra.s32 %s878_s18, 4  ;;  %s1282_s20 = int_to_ptr.hbm [resolvable:$true] %s1281_s20 }
 0x1aa   : > { %s1283_s24 = scalar_lea.hbm %s1282_s20, 16  ;;  %p1288_p5 = scmp.lt.s32.totalorder %s1282_s20, %s1832_s5 }
 0x1ab   : > { %p1284_p1 = scmp.ne.s32.totalorder %s1282_s20, %s1283_s24 }
 0x1ad   : > { %p1285_p2 = pnand %p1284_p1, %p1502_p4 }
 0x1af   : > { %p1286_p3 = pneg %p1285_p2 }
 0x1f3   : > { %v1204_v37 = vpop.permute.xlu2 %1203 }
 0x1f4   : > { %v1206_v38 = vunpack.i.h.bf16 %v1204_v37  ;;  %v1205_v39 = vunpack.i.l.bf16 %v1204_v37 }
 0x1f6   : > { %v1217_v40 = vpack.i.bf16 %v1206_v38, %v389_v18  ;;  %v1222_v41 = vpack.i.bf16 %v1205_v39, %v428_v32  ;;  %v1560_v18 = vunpack.c.0.s8 %v470_v3 }
 0x1f8   : > { %1223 = vrot.lane.b32.xlu2 %v1222_v41, %s1415_s13  ;;  %1218 = vrot.lane.b32.xlu1 %v1217_v40, %s1836_s30 }
 0x1fb   : > { %v1209_v42 = vpop.permute.xlu2 %1208 }
 0x1fc   : > { %v1210_v44 = vunpack.i.l.bf16 %v1209_v42  ;;  %v1211_v48 = vunpack.i.h.bf16 %v1209_v42 }
 0x200   : > { %437 = vrot.lane.b32.xlu1 %v429_v36, %s1418_s19  ;;  %s1681_s19 = scalar_lea.sflag [#allocation7], %s838_s15 }
 0x20b   : > { %v1214_v43 = vpop.permute.xlu1 %1213 }
 0x20c   : > { %v1215_v45 = vunpack.i.l.bf16 %v1214_v43  ;;  %v1216_v47 = vunpack.i.h.bf16 %v1214_v43 }
 0x20e   : > { %v1227_v46 = vpack.i.bf16 %v1215_v45, %v1210_v44  ;;  %v1232_v49 = vpack.i.bf16 %v1216_v47, %v1211_v48 }
 0x210   : > { %1228 = vrot.lane.b32.xlu2 %v1227_v46, %s1415_s13 }
 0x213   : > { %v435_v53 = vpop.permute.xlu0 %434 }
 0x214   : > { %v440_v56 = vrot.slane %v435_v53, 4  ;;  %v444_v62 = vsel %vm441_vm1, %v435_v53, %v443_v59 }
 0x215   : > { %v1556_v10 = vperm.slane %v444_v62, %v1546_v60 }
 0x216   : > { %v442_v61 = vsel %vm441_vm1, %v440_v56, %v429_v36 }
 0x217   : > { %v1553_v9 = vperm.slane %v442_v61, %v1546_v60  ;;  %v479_v27 = vrot.slane %v1556_v10, 4 }
 0x218   : > { %1233 = vrot.lane.b32.xlu2 %v1232_v49, %s1836_s30 }
 0x219   : > { %v467_v26 = vrot.slane %v1553_v9, 4 }
 0x21b   : > { %v432_v17 = vpop.permute.xlu0 %431 }
 0x21c   : > { %v455_v28 = vrot.slane %v432_v17, 4 }
 0x252   : > { %v1224_v50 = vpop.permute.xlu2 %1223 }
 0x253   : > { %v1226_v51 = vunpack.i.h.bf16 %v1224_v50  ;;  %v1225_v52 = vunpack.i.l.bf16 %v1224_v50 }
 0x255   : > { %v579_v57 = vrot.slane %v1226_v51, 4  ;;  %v581_v58 = vrot.slane %v1225_v52, 4 }
 0x257   : > { %v580_v63 = vsel %vm441_vm1, %v579_v57, %v1225_v52  ;;  %v582_v0 = vsel %vm441_vm1, %v1226_v51, %v581_v58 }
 0x258   : > { %v586_v11 = vperm.slane %v580_v63, %v1546_v60  ;;  %v590_v12 = vperm.slane %v582_v0, %v1546_v60 }
 0x25a   : > { %v605_v23 = vrot.slane %v586_v11, 4  ;;  %v617_v29 = vrot.slane %v590_v12, 4 }
 0x26a   : > { %v1219_v1 = vpop.permute.xlu1 %1218  ;;  %v1229_v4 = vpop.permute.xlu2 %1228 }
 0x26b   : > { %v1221_v5 = vunpack.i.h.bf16 %v1219_v1  ;;  %v1220_v6 = vunpack.i.l.bf16 %v1219_v1  ;;  %v1231_v7 = vunpack.i.h.bf16 %v1229_v4  ;;  %v1230_v8 = vunpack.i.l.bf16 %v1229_v4 }
 0x26d   : > { %v715_v13 = vrot.slane %v1221_v5, 4  ;;  %v717_v14 = vrot.slane %v1220_v6, 4  ;;  %v591_v15 = vrot.slane %v1231_v7, 4  ;;  %v593_v16 = vrot.slane %v1230_v8, 4 }
 0x26f   : > { %v716_v19 = vsel %vm441_vm1, %v715_v13, %v1220_v6  ;;  %v718_v20 = vsel %vm441_vm1, %v1221_v5, %v717_v14  ;;  %v592_v21 = vsel %vm441_vm1, %v591_v15, %v1230_v8  ;;  %v594_v22 = vsel %vm441_vm1, %v1231_v7, %v593_v16 }
 0x270   : > { %v598_v24 = vperm.slane %v592_v21, %v1546_v60  ;;  %v602_v25 = vperm.slane %v594_v22, %v1546_v60  ;;  %v1571_v30 = vperm.slane %v716_v19, %v1546_v60  ;;  %v1574_v31 = vperm.slane %v718_v20, %v1546_v60 }
 0x272   : > { %v603_v32 = vrot.slane %v598_v24, 4  ;;  %v606_v33 = vsel %vm441_vm1, %v598_v24, %v605_v23  ;;  %v438_v34 = vpop.permute.xlu1 %437  ;;  %v1577_v35 = vpop.permute.xlu2 %1233  ;;  %v615_v37 = vrot.slane %v602_v25, 4  ;;  %v618_v38 = vsel %vm441_vm1, %v602_v25, %v617_v29 }
 0x273   : > { %v614_v36 = vperm.slane %v606_v33, %v1560_v18  ;;  %v453_v39 = vrot.slane %v438_v34, 4  ;;  %v626_v41 = vperm.slane %v618_v38, %v1560_v18  ;;  %v456_v42 = vsel %vm441_vm1, %v438_v34, %v455_v28 }
 0x274   : > { %v604_v40 = vsel %vm441_vm1, %v603_v32, %v586_v11  ;;  %v1236_v43 = vunpack.i.h.bf16 %v1577_v35  ;;  %v616_v45 = vsel %vm441_vm1, %v615_v37, %v590_v12  ;;  %v464_v51 = vperm.slane %v456_v42, %v1546_v60 }
 0x275   : > { %v610_v44 = vperm.slane %v604_v40, %v1560_v18  ;;  %v629_v46 = vrot.slane %v614_v36, 4  ;;  %v454_v47 = vsel %vm441_vm1, %v453_v39, %v432_v17  ;;  %v622_v48 = vperm.slane %v616_v45, %v1560_v18 }
 0x276   : > { %v633_v49 = vrot.slane %v626_v41, 4  ;;  %v460_v50 = vperm.slane %v454_v47, %v1546_v60  ;;  %v1595_v55 = vrot.slane %v1236_v43, 4  ;;  %v477_v17 = vrot.slane %v464_v51, 4 }
 0x277   : > { %v627_v52 = vrot.slane %v610_v44, 4  ;;  %v630_v53 = vsel %vm441_vm1, 0.0, %v629_v46  ;;  %v635_v54 = vsel %vm441_vm1, %v629_v46, %v610_v44  ;;  %v631_v56 = vrot.slane %v622_v48, 4 }
 0x278   : > { %v634_v57 = vsel %vm441_vm1, 0.0, %v633_v49  ;;  %v639_v58 = vperm.slane %v635_v54, %v1546_v60  ;;  %v640_v59 = vrot.slane %v630_v53, 4  ;;  %v646_v62 = vsel %vm441_vm1, %v633_v49, %v622_v48 }
 0x279   : > { %v628_v61 = vsel %vm441_vm1, 0.0, %v627_v52  ;;  %v651_v63 = vrot.slane %v634_v57, 4  ;;  %v465_v0 = vrot.slane %v460_v50, 4  ;;  %v632_v1 = vsel %vm441_vm1, 0.0, %v631_v56 }
 0x27a   : > { %v641_v2 = vsel %vm441_vm1, %v640_v59, %v628_v61  ;;  %v650_v3 = vperm.slane %v646_v62, %v1546_v60  ;;  %v659_v4 = vrot.slane %v639_v58, 4  ;;  %v468_v8 = vsel %vm441_vm1, %v460_v50, %v467_v26 }
 0x27b   : > { %v645_v5 = vperm.slane %v641_v2, %v1546_v60  ;;  %v652_v6 = vsel %vm441_vm1, %v651_v63, %v632_v1  ;;  %v466_v7 = vsel %vm441_vm1, %v465_v0, %v1553_v9  ;;  %v476_v14 = vperm.slane %v468_v8, %v1560_v18 }
 0x27c   : > { %v656_v11 = vperm.slane %v652_v6, %v1546_v60  ;;  %v671_v12 = vrot.slane %v650_v3, 4  ;;  %v472_v13 = vperm.slane %v466_v7, %v1560_v18  ;;  %v480_v19 = vsel %vm441_vm1, %v464_v51, %v479_v27 }
 0x27d   : > { %v657_v15 = vrot.slane %v645_v5, 4  ;;  %v660_v16 = vsel %vm441_vm1, %v645_v5, %v659_v4  ;;  %v488_v22 = vperm.slane %v480_v19, %v1560_v18  ;;  %v478_v25 = vsel %vm441_vm1, %v477_v17, %v1556_v10 }
 0x27e   : > { %v668_v20 = vperm.slane %v660_v16, %v1560_v18  ;;  %v669_v9 = vrot.slane %v656_v11, 4  ;;  %v672_v21 = vsel %vm441_vm1, %v656_v11, %v671_v12  ;;  %v489_v26 = vrot.slane %v472_v13, 4 }
 0x27f   : > { %v658_v23 = vsel %vm441_vm1, %v657_v15, %v639_v58  ;;  %v680_v24 = vperm.slane %v672_v21, %v1560_v18  ;;  %v484_v32 = vperm.slane %v478_v25, %v1560_v18  ;;  %v491_v37 = vrot.slane %v476_v14, 4 }
 0x280   : > { %v664_v28 = vperm.slane %v658_v23, %v1560_v18  ;;  %v670_v27 = vsel %vm441_vm1, %v669_v9, %v650_v3  ;;  %v687_v29 = vrot.slane %v668_v20, 4  ;;  %v490_v36 = vsel %vm441_vm1, 0.0, %v489_v26 }
 0x281   : > { %v676_v33 = vperm.slane %v670_v27, %v1560_v18  ;;  %v685_v34 = vrot.slane %v680_v24, 4  ;;  %v493_v39 = vrot.slane %v484_v32, 4  ;;  %v495_v40 = vrot.slane %v488_v22, 4 }
 0x282   : > { %v683_v10 = vrot.slane %v664_v28, 4  ;;  %v688_v38 = vsel %vm441_vm1, %v680_v24, %v687_v29  ;;  %v492_v45 = vsel %vm441_vm1, 0.0, %v491_v37  ;;  %v497_v52 = vsel %vm441_vm1, %v491_v37, %v472_v13 }
 0x283   : > { %v681_v41 = vrot.slane %v676_v33, 4  ;;  %v686_v42 = vsel %vm441_vm1, %v685_v34, %v668_v20  ;;  %v692_v44 = vpack.c.bf16 %v688_v38, %v688_v38  ;;  %v494_v48 = vsel %vm441_vm1, 0.0, %v493_v39 }
 0x284   : > { %v684_v46 = vsel %vm441_vm1, %v676_v33, %v683_v10  ;;  %v691_v47 = vpack.c.bf16 %v686_v42, %v686_v42  ;;  %v496_v49 = vsel %vm441_vm1, 0.0, %v495_v40  ;;  %v502_v53 = vrot.slane %v492_v45, 4 }
 0x285   : > { %v682_v50 = vsel %vm441_vm1, %v681_v41, %v664_v28  ;;  %v690_v51 = vpack.c.bf16 %v684_v46, %v684_v46  ;;  %v501_v56 = vperm.slane %v497_v52, %v1546_v60  ;;  %v508_v57 = vsel %vm441_vm1, %v495_v40, %v484_v32  ;;  %696 = vst.msk [vmem:[%s317_s16 + $0xc] sm:$0xf] %vm555_vm2, %v692_v44 }
 0x286   : > { %v689_v54 = vpack.c.bf16 %v682_v50, %v682_v50  ;;  %v513_v58 = vrot.slane %v496_v49, 4  ;;  %v503_v59 = vsel %vm441_vm1, %v502_v53, %v490_v36  ;;  %v512_v61 = vperm.slane %v508_v57, %v1546_v60  ;;  %695 = vst.msk [vmem:[%s317_s16 + $0x8] sm:$0xf] %vm555_vm2, %v691_v47 }
 0x287   : > { %v1235_v62 = vunpack.i.l.bf16 %v1577_v35  ;;  %v741_v63 = vrot.slane %v1571_v30, 4  ;;  %v507_v0 = vperm.slane %v503_v59, %v1546_v60  ;;  %v521_v2 = vrot.slane %v501_v56, 4  ;;  %694 = vst.msk [vmem:[%s317_s16 + $0x4] sm:$0xf] %vm555_vm2, %v690_v51 }
 0x288   : > { %v514_v1 = vsel %vm441_vm1, %v513_v58, %v494_v48  ;;  %693 = vst.msk [vmem:[%s317_s16] sm:$0xf] %vm555_vm2, %v689_v54  ;;  %v533_v4 = vrot.slane %v512_v61, 4  ;;  %v753_v7 = vrot.slane %v1574_v31, 4  ;;  %s1287_s16 = scalar_lea.hbm %s1832_s5, 32 }
 0x289   : > { %v518_v3 = vperm.slane %v514_v1, %v1546_v60  ;;  %v728_v5 = vsel %vm441_vm1, %v1595_v55, %v1235_v62  ;;  %v729_v6 = vrot.slane %v1235_v62, 4  ;;  %v519_v8 = vrot.slane %v507_v0, 4  ;;  %p1289_p6 = scmp.lt.s32.totalorder %s1287_s16, %s1283_s24 }
 0x28a   : > { %v522_v11 = vsel %vm441_vm1, %v507_v0, %v521_v2  ;;  %v734_v12 = vperm.slane %v728_v5, %v1546_v60 }
 0x28b   : > { %v530_v55 = vperm.slane %v522_v11, %v1560_v18  ;;  %v531_v13 = vrot.slane %v518_v3, 4  ;;  %v534_v14 = vsel %vm441_vm1, %v518_v3, %v533_v4  ;;  %v730_v15 = vsel %vm441_vm1, %v1236_v43, %v729_v6  ;;  %p1290_p7 = por %p1289_p6, %p1288_p5 }
 0x28c   : > { %v520_v16 = vsel %vm441_vm1, %v519_v8, %v501_v56  ;;  %v542_v17 = vperm.slane %v534_v14, %v1560_v18  ;;  %v738_v19 = vperm.slane %v730_v15, %v1546_v60  ;;  %v739_v20 = vrot.slane %v734_v12, 4 }
 0x28d   : > { %p1291_p9 = pnand %p1290_p7, %p1286_p3 }
 0x28f   : > { %1294 = shalt.err (!%p1291_p9)
}
 0x290   : > { %s1423_s27 = smov 4   ;;  %v526_v35 = vperm.slane %v520_v16, %v1560_v18  ;;  %v532_v43 = vsel %vm441_vm1, %v531_v13, %v512_v61  ;;  %v549_v9 = vrot.slane %v530_v55, 4  ;;  %v742_v21 = vsel %vm441_vm1, %v734_v12, %v741_v63  ;;  %s856_s15 = scalar_lea.hbm %s1831_s4, %s1626_s11 }
 0x291   : > { %1118 = dma.vmem_to_hbm [thread:$0]  (%p1502_p4), %s1663_s17, 256, %s878_s18, %s1681_s19, %s1836_s30, %s1836_s30, %s1423_s27   ;;  %v538_v22 = vperm.slane %v532_v43, %v1560_v18  ;;  %v547_v23 = vrot.slane %v542_v17, 4  ;;  %v740_v24 = vsel %vm441_vm1, %v739_v20, %v1571_v30  ;;  %v750_v25 = vperm.slane %v742_v21, %v1560_v18 }
 0x292   : > { %v545_v26 = vrot.slane %v526_v35, 4  ;;  %v550_v28 = vsel %vm441_vm1, %v542_v17, %v549_v9  ;;  %v746_v27 = vperm.slane %v740_v24, %v1560_v18  ;;  %v751_v29 = vrot.slane %v738_v19, 4  ;;  %s310_s17 = scalar_lea.vmem [#allocation5], %s1633_s12  ;;  %s1718_s20 = sshll.u32 %s856_s15, 4  ;;  %s860_s20 = int_to_ptr.hbm [resolvable:$true] %s1718_s20 }
 0x293   : > { %v543_v32 = vrot.slane %v538_v22, 4  ;;  %v548_v33 = vsel %vm441_vm1, %v547_v23, %v530_v55  ;;  %v554_v34 = vpack.c.bf16 %v550_v28, %v550_v28  ;;  %v754_v36 = vsel %vm441_vm1, %v738_v19, %v753_v7  ;;  %s857_s18 = sshll.u32 %s310_s17, 4  ;;  %s1840_s24 = sand.u32 1, %s1393_s22   ;;  %s1728_s18 = int_to_ptr.vmem [resolvable:$true] %s857_s18 }
 0x294   : > { %v546_v30 = vsel %vm441_vm1, %v538_v22, %v545_v26  ;;  %v553_v37 = vpack.c.bf16 %v548_v33, %v548_v33  ;;  %v752_v10 = vsel %vm441_vm1, %v751_v29, %v1574_v31  ;;  %v762_v38 = vperm.slane %v754_v36, %v1560_v18  ;;  %s834_s13 = scalar_lea.sflag [#allocation4], %s1840_s24  ;;  %s1309_s14 = sshra.s32 %s860_s20, 4  ;;  %s1310_s14 = int_to_ptr.hbm [resolvable:$true] %s1309_s14 }
 0x295   : > { %v544_v39 = vsel %vm441_vm1, %v543_v32, %v526_v35  ;;  %v552_v40 = vpack.c.bf16 %v546_v30, %v546_v30  ;;  %v758_v41 = vperm.slane %v752_v10, %v1560_v18  ;;  %v763_v42 = vrot.slane %v746_v27, 4  ;;  %559 = vst.msk [vmem:[%s310_s17 + $0xc] sm:$0xf] %vm555_vm2, %v554_v34  ;;  %s1311_s16 = scalar_lea.hbm %s1310_s14, 16  ;;  %s1315_s15 = scalar_lea.hbm %s1831_s4, 32 }
 0x296   : > { %v551_v44 = vpack.c.bf16 %v544_v39, %v544_v39  ;;  %v765_v45 = vrot.slane %v750_v25, 4  ;;  %v769_v46 = vrot.slane %v762_v38, 4  ;;  %558 = vst.msk [vmem:[%s310_s17 + $0x8] sm:$0xf] %vm555_vm2, %v553_v37  ;;  %p1312_p10 = scmp.ne.s32.totalorder %s1310_s14, %s1311_s16  ;;  %p1316_p13 = scmp.lt.s32.totalorder %s1310_s14, %s1831_s4 }
 0x297   : > { %v764_v31 = vsel %vm441_vm1, 0.0, %v763_v42  ;;  %v767_v47 = vrot.slane %v758_v41, 4  ;;  %557 = vst.msk [vmem:[%s310_s17 + $0x4] sm:$0xf] %vm555_vm2, %v552_v40  ;;  %p1317_p0 = scmp.lt.s32.totalorder %s1315_s15, %s1311_s16 }
 0x298   : > { %v766_v48 = vsel %vm441_vm1, 0.0, %v765_v45  ;;  %v770_v49 = vsel %vm441_vm1, 0.0, %v769_v46  ;;  %v771_v50 = vsel %vm441_vm1, %v765_v45, %v746_v27  ;;  %v782_v51 = vsel %vm441_vm1, %v769_v46, %v758_v41  ;;  %556 = vst.msk [vmem:[%s310_s17] sm:$0xf] %vm555_vm2, %v551_v44  ;;  %p1313_p11 = pnand %p1312_p10, %p1502_p4 }
 0x299   : > { %v768_v52 = vsel %vm441_vm1, 0.0, %v767_v47  ;;  %v775_v53 = vperm.slane %v771_v50, %v1546_v60  ;;  %v776_v54 = vrot.slane %v766_v48, 4  ;;  %v786_v56 = vperm.slane %v782_v51, %v1546_v60  ;;  %p1318_p1 = por %p1317_p0, %p1316_p13 }
 0x29a   : > { %p1314_p12 = pneg %p1313_p11 }
 0x29c   : > { %p1319_p2 = pnand %p1318_p1, %p1314_p12 }
 0x29e   : > { %1322 = shalt.err (!%p1319_p2)
}
 0x29f   : > { %s1841_s24 = smov 64   ;;  %v787_v57 = vrot.slane %v770_v49, 4  ;;  %v777_v58 = vsel %vm441_vm1, %v776_v54, %v764_v31  ;;  %v795_v59 = vrot.slane %v775_v53, 4  ;;  %v807_v61 = vrot.slane %v786_v56, 4  ;;  %s324_s14 = scalar_lea.vmem [#allocation8], %s1633_s12 }
 0x2a0   : > { %1117 = dma.vmem_to_hbm [thread:$0]  (%p1502_p4), %s1728_s18, 256, %s860_s20, %s834_s13, %s1841_s24, %s1841_s24, %s1423_s27   ;;  %v781_v62 = vperm.slane %v777_v58, %v1546_v60 }
 0x2a1   : > { %v788_v63 = vsel %vm441_vm1, %v787_v57, %v768_v52  ;;  %s892_s20 = scalar_lea.hbm %s1833_s6, %s1626_s11  ;;  %s893_s16 = sshll.u32 %s324_s14, 4  ;;  %s894_s16 = int_to_ptr.vmem [resolvable:$true] %s893_s16 }
 0x2a2   : > { %v792_v0 = vperm.slane %v788_v63, %v1546_v60  ;;  %v793_v1 = vrot.slane %v781_v62, 4  ;;  %v796_v2 = vsel %vm441_vm1, %v781_v62, %v795_v59  ;;  %s1779_s13 = sshll.u32 %s892_s20, 4  ;;  %s1343_s15 = scalar_lea.hbm %s1833_s6, 32  ;;  %s896_s13 = int_to_ptr.hbm [resolvable:$true] %s1779_s13 }
 0x2a3   : > { %v804_v3 = vperm.slane %v796_v2, %v1560_v18  ;;  %s1337_s11 = sshra.s32 %s896_s13, 4  ;;  %s1338_s11 = int_to_ptr.hbm [resolvable:$true] %s1337_s11 }
 0x2a4   : > { %v805_v4 = vrot.slane %v792_v0, 4  ;;  %v808_v5 = vsel %vm441_vm1, %v792_v0, %v807_v61  ;;  %v794_v6 = vsel %vm441_vm1, %v793_v1, %v775_v53  ;;  %s1339_s12 = scalar_lea.hbm %s1338_s11, 16  ;;  %p1344_p7 = scmp.lt.s32.totalorder %s1338_s11, %s1833_s6 }
 0x2a5   : > { %v816_v7 = vperm.slane %v808_v5, %v1560_v18  ;;  %v800_v8 = vperm.slane %v794_v6, %v1560_v18  ;;  %v823_v12 = vrot.slane %v804_v3, 4  ;;  %p1340_p3 = scmp.ne.s32.totalorder %s1338_s11, %s1339_s12  ;;  %p1345_p9 = scmp.lt.s32.totalorder %s1343_s15, %s1339_s12 }
 0x2a6   : > { %v806_v11 = vsel %vm441_vm1, %v805_v4, %v786_v56 }
 0x2a7   : > { %v812_v60 = vperm.slane %v806_v11, %v1560_v18  ;;  %v821_v55 = vrot.slane %v816_v7, 4  ;;  %v819_v13 = vrot.slane %v800_v8, 4  ;;  %v824_v14 = vsel %vm441_vm1, %v816_v7, %v823_v12  ;;  %p1341_p5 = pnand %p1340_p3, %p1502_p4  ;;  %p1346_p10 = por %p1345_p9, %p1344_p7 }
 0x2a8   : > { %v828_v17 = vpack.c.bf16 %v824_v14, %v824_v14 }
 0x2a9   : > { %v817_v15 = vrot.slane %v812_v60, 4  ;;  %v822_v16 = vsel %vm441_vm1, %v821_v55, %v804_v3  ;;  %v820_v19 = vsel %vm441_vm1, %v812_v60, %v819_v13  ;;  %p1342_p6 = pneg %p1341_p5 }
 0x2aa   : > { %v827_v20 = vpack.c.bf16 %v822_v16, %v822_v16  ;;  %v826_v18 = vpack.c.bf16 %v820_v19, %v820_v19  ;;  %832 = vst.msk [vmem:[%s324_s14 + $0xc] sm:$0xf] %vm555_vm2, %v828_v17 }
 0x2ab   : > { %v818_v35 = vsel %vm441_vm1, %v817_v15, %v800_v8  ;;  %p1347_p11 = pnand %p1346_p10, %p1342_p6 }
 0x2ac   : > { %v825_v43 = vpack.c.bf16 %v818_v35, %v818_v35  ;;  %831 = vst.msk [vmem:[%s324_s14 + $0x8] sm:$0xf] %vm555_vm2, %v827_v20 }
 0x2ad   : > { %830 = vst.msk [vmem:[%s324_s14 + $0x4] sm:$0xf] %vm555_vm2, %v826_v18 }
 0x2ae   : > { %829 = vst.msk [vmem:[%s324_s14] sm:$0xf] %vm555_vm2, %v825_v43 }
 0x2af   : > { %1350 = shalt.err (!%p1347_p11)
}
 0x2b0   : > { %1119 = dma.vmem_to_hbm [thread:$0]  (%p1502_p4), %s894_s16, 256, %s896_s13, %s1681_s19, %s1841_s24, %s1841_s24, %s1423_s27  }
 0x2b1 PF: > { %p1139_p12 = scmp.ge.s32.totalorder %s1409_s26, 2  ;;  %s910_s18 = sand.u32 1, %s1389_s21  }
 0x2b2   : > { %s911_s20 = scalar_lea.sflag [#allocation4], %s910_s18 }
 0x2b3   : > { %p1128_p13 = pnand %p1139_p12, %p1511_p8 }
 0x2b5   : > { %p1129_p0 = pneg %p1128_p13 }
 0x2b7   : > { %1380 = dma.done.wait (%p1129_p0), %s911_s20, 256  }
 0x2b8   : > { %1382 = vsyncadd (%p1129_p0), %s911_s20, 4294967040  ;;  %s1842_s14 = sadd.s32 4294967294, %s1409_s26  }
 0x2b9   : > { %s920_s7 = sand.u32 1, %s1842_s14  }
 0x2ba   : > { %s921_s11 = scalar_lea.sflag [#allocation7], %s920_s7 }
 0x2bb   : > { %1384 = dma.done.wait (%p1129_p0), %s921_s11, 512  }
 0x2bc   : > { %1386 = vsyncadd (%p1129_p0), %s921_s11, 4294966784  ;;  %s24_s26 = sadd.s32 1, %s1409_s26   ;;  %s1843_s21 = smov %s1393_s22 }
 0x2bd   : > { %p21_p4 = scmp.ge.s32.totalorder %s24_s26, 4   ;;  %s1844_s22 = smov %s1397_s23 }
 0x2be   : > { %s1845_s23 = smov %s1517_s10  ;;  %s1846_s24 = smov %s1405_s25 }
 0x2bf   : > { %s1847_s25 = smov %s1849_s29  ;;  %23 = sbr.rel (!%p21_p4) target bundleno = 7 (0x7), region = 111 }
 0x2c4   :  { %937 = vsyncpa [#allocation3], 1 }
 0x2c5   :  { %939 = vsyncpa [#allocation3 + $0x1], 1 }
 0x2c6   :  { %940 = vsyncpa [#allocation4], 1 }
 0x2c7   :  { %942 = vsyncpa [#allocation4 + $0x1], 1 }
 0x2c8   :  { %943 = vsyncpa [#allocation7], 1 }
 0x2c9   :  { %945 = vsyncpa [#allocation7 + $0x1], 1 }

</bundles_post_ra>
